<compile_context>
chip_gen: v6e
topology: v6e:2x2x1
jax: 0.10.0
libtpu: 0.0.40
codegen_flags: <defaults>
</compile_context>

<pallas_src>
import functools

import jax
import jax.numpy as jnp
from jax.experimental import pallas as pl
from jax.experimental.pallas import tpu as pltpu

_LANE = 128
_SUBLANE = 8


def _round_up(x, m):
    return ((x + m - 1) // m) * m


def _location_mlp_kernel(x_ref,
                         w1_ref, b1_ref,
                         w2_ref, b2_ref,
                         w3_ref, b3_ref,
                         w4_ref, b4_ref,
                         w5_ref, b5_ref,
                         out_ref):
    def layer(z_bf16, w_ref, b_ref, relu):
        # bf16 x bf16 matmul with f32 accumulation on the MXU.
        acc = jnp.dot(z_bf16, w_ref[...],
                      preferred_element_type=jnp.float32) + b_ref[...]
        if relu:
            acc = jnp.maximum(acc, 0.0)
        return acc

    z = layer(x_ref[...], w1_ref, b1_ref, relu=True)            # fc_1 + ReLU
    z = layer(z.astype(jnp.bfloat16), w2_ref, b2_ref, relu=True)  # fc_2 + ReLU
    z = layer(z.astype(jnp.bfloat16), w3_ref, b3_ref, relu=True)  # fc_3 + ReLU
    z = layer(z.astype(jnp.bfloat16), w4_ref, b4_ref, relu=True)  # fc_4 + ReLU
    z = layer(z.astype(jnp.bfloat16), w5_ref, b5_ref, relu=False)  # fc_5
    out_ref[...] = z.astype(out_ref.dtype)


def _init_linear(key, in_dim, out_dim):
    """nn.Linear-style U(-1/sqrt(in), 1/sqrt(in)) init; W stored as (in, out)."""
    kw, kb = jax.random.split(key)
    bound = 1.0 / jnp.sqrt(jnp.float32(in_dim))
    w = jax.random.uniform(kw, (in_dim, out_dim), jnp.float32, -bound, bound)
    b = jax.random.uniform(kb, (out_dim,), jnp.float32, -bound, bound)
    return w, b


def make_location_module_params(key, encoder_output_dim, num_hiddens, output_dim):
    in_dim = encoder_output_dim * num_hiddens
    dims = [(in_dim, 1024), (1024, 512), (512, 512), (512, 64), (64, output_dim)]
    keys = jax.random.split(key, len(dims))
    return tuple(_init_linear(k, di, do) for k, (di, do) in zip(keys, dims))


def prepare_params(params):
    """Zero-pad tail layers to lane width 128, pad K of W1 to a lane multiple,
    and cast weights to bf16.

    Returns 5 tuples of (W bf16 (in, out), b f32 (1, out)) ready for the kernel.
    """
    (w1, b1), (w2, b2), (w3, b3), (w4, b4), (w5, b5) = params
    in_dim = w1.shape[0]
    in_pad = _round_up(in_dim, _LANE)
    h4_pad = _round_up(w4.shape[1], _LANE)           # 64  -> 128
    out_pad = _round_up(w5.shape[1], _LANE)          # out -> 128

    def pad2(w, rows, cols):
        return jnp.pad(w, ((0, rows - w.shape[0]), (0, cols - w.shape[1])))

    w1 = pad2(w1, in_pad, w1.shape[1])               # zero rows for padded K
    w4 = pad2(w4, w4.shape[0], h4_pad)               # zero cols
    w5 = pad2(w5, h4_pad, out_pad)                   # zero rows + zero cols
    b4 = jnp.pad(b4, (0, h4_pad - b4.shape[0]))      # padded bias entries == 0
    b5 = jnp.pad(b5, (0, out_pad - b5.shape[0]))

    def prep(w, b):
        return w.astype(jnp.bfloat16), b.astype(jnp.float32).reshape(1, -1)

    return (prep(w1, b1), prep(w2, b2), prep(w3, b3), prep(w4, b4), prep(w5, b5))


@functools.partial(jax.jit, static_argnames=("output_dim",))
def location_module_forward(x, prepared, *, output_dim):
    """x: (B, encoder_output_dim, num_hiddens) f32 -> (B, output_dim) f32."""
    B = x.shape[0]
    x2d = x.reshape(B, -1)                           # torch.flatten(x, start_dim=1)

    (w1, b1), (w2, b2), (w3, b3), (w4, b4), (w5, b5) = prepared
    in_pad = w1.shape[0]
    out_pad = w5.shape[1]

    # Pad feature dim to match the zero-padded rows of W1 (numerically exact).
    if x2d.shape[1] != in_pad:
        x2d = jnp.pad(x2d, ((0, 0), (0, in_pad - x2d.shape[1])))
    x2d = x2d.astype(jnp.bfloat16)

    # Batch tile: multiple of 8 sublanes; cap at 512 rows to amortize per-step
    # overhead while keeping the tile well inside VMEM.
    if B <= 512:
        TB = _round_up(B, _SUBLANE)
    else:
        TB = 512
    B_pad = _round_up(B, TB)
    if B_pad != B:
        x2d = jnp.pad(x2d, ((0, B_pad - B), (0, 0)))
    grid = (B_pad // TB,)

    def w_spec(arr):
        # Full-shape block + constant index_map => stays resident in VMEM.
        return pl.BlockSpec(arr.shape, lambda i: (0, 0))

    in_specs = [
        pl.BlockSpec((TB, in_pad), lambda i: (i, 0)),
        w_spec(w1), w_spec(b1),
        w_spec(w2), w_spec(b2),
        w_spec(w3), w_spec(b3),
        w_spec(w4), w_spec(b4),
        w_spec(w5), w_spec(b5),
    ]
    out_specs = pl.BlockSpec((TB, out_pad), lambda i: (i, 0))

    # Advisory cost estimate for XLA scheduling.
    flops = 2 * B_pad * (in_pad * 1024 + 1024 * 512 + 512 * 512
                         + 512 * w4.shape[1] + w5.shape[0] * out_pad)
    weight_bytes = sum(int(w.size) * 2 + int(b.size) * 4 for (w, b) in prepared)
    bytes_accessed = int(x2d.size) * 2 + weight_bytes + B_pad * out_pad * 4
    cost = pl.CostEstimate(flops=flops, transcendentals=0,
                           bytes_accessed=bytes_accessed)

    # Resident VMEM: weights/biases (double-buffered allocations) +
    # double-buffered x and out tiles, plus headroom for intermediates.
    resident = (2 * weight_bytes
                + 2 * TB * in_pad * 2      # bf16 x tile, double-buffered
                + 2 * TB * out_pad * 4     # f32 out tile, double-buffered
                + TB * 1024 * 4 * 2)       # largest f32 intermediate headroom
    vmem_limit = int(min(max(2 * resident, 32 << 20), 64 << 20))

    out = pl.pallas_call(
        _location_mlp_kernel,
        out_shape=jax.ShapeDtypeStruct((B_pad, out_pad), jnp.float32),
        grid=grid,
        in_specs=in_specs,
        out_specs=out_specs,
        compiler_params=pltpu.CompilerParams(
            dimension_semantics=("parallel",),   # v7x: shard batch over 2 TCs
            vmem_limit_bytes=vmem_limit),
        cost_estimate=cost,
    )(x2d, w1, b1, w2, b2, w3, b3, w4, b4, w5, b5)

    return out[:B, :output_dim]


def _reference_forward(x, prepared, output_dim):
    """Pure-JAX reference mimicking the kernel's bf16/f32 math."""
    (w1, _), _, _, _, _ = prepared
    z = x.reshape(x.shape[0], -1)
    if z.shape[1] != w1.shape[0]:
        z = jnp.pad(z, ((0, 0), (0, w1.shape[0] - z.shape[1])))
    z = z.astype(jnp.bfloat16)
    for idx, (w, b) in enumerate(prepared):
        z = jnp.dot(z, w, preferred_element_type=jnp.float32) + b
        if idx < len(prepared) - 1:
            z = jnp.maximum(z, 0.0).astype(jnp.bfloat16)
    return z[:, :output_dim]


if __name__ == "__main__":
    # Small, deterministic example shapes consistent with the module.
    batch = 2
    encoder_output_dim = 4
    num_hiddens = 32
    output_dim = 3

    root = jax.random.PRNGKey(0)
    kx, kp = jax.random.split(root)

    x = jax.random.normal(kx, (batch, encoder_output_dim, num_hiddens),
                          dtype=jnp.float32)
    params_f32 = make_location_module_params(kp, encoder_output_dim,
                                             num_hiddens, output_dim)
    prepared = prepare_params(params_f32)

    out = location_module_forward(x, prepared, output_dim=output_dim)
    out = jax.block_until_ready(out)

    ref = _reference_forward(x, prepared, output_dim)
    assert out.shape == (batch, output_dim), out.shape
    assert jnp.allclose(out, ref, atol=1e-2, rtol=1e-2), (
        float(jnp.max(jnp.abs(out - ref))))

    print("KERNEL_OK")
</pallas_src>

<mosaic_0001>
module attributes {stable_mosaic.version = 11 : i64} {
  func.func @_location_mlp_kernel(%arg0: i32, %arg1: memref<8x128xbf16, #tpu.memory_space<vmem>>, %arg2: memref<128x1024xbf16, #tpu.memory_space<vmem>>, %arg3: memref<1x1024xf32, #tpu.memory_space<vmem>>, %arg4: memref<1024x512xbf16, #tpu.memory_space<vmem>>, %arg5: memref<1x512xf32, #tpu.memory_space<vmem>>, %arg6: memref<512x512xbf16, #tpu.memory_space<vmem>>, %arg7: memref<1x512xf32, #tpu.memory_space<vmem>>, %arg8: memref<512x128xbf16, #tpu.memory_space<vmem>>, %arg9: memref<1x128xf32, #tpu.memory_space<vmem>>, %arg10: memref<128x128xbf16, #tpu.memory_space<vmem>>, %arg11: memref<1x128xf32, #tpu.memory_space<vmem>>, %arg12: memref<8x128xf32, #tpu.memory_space<vmem>>) attributes {dimension_semantics = [#tpu.dimension_semantics<parallel>], iteration_bounds = array<i64: 1>, scalar_prefetch = 0 : i64, scratch_operands = 0 : i64, tpu.core_type = #tpu.core_type<tc>, window_params = [{transform_indices = @transform_0, window_bounds = array<i64: 8, 128>}, {pipeline_mode = #tpu.pipeline_mode<synchronous>, transform_indices = @transform_1, window_bounds = array<i64: 128, 1024>}, {pipeline_mode = #tpu.pipeline_mode<synchronous>, transform_indices = @transform_2, window_bounds = array<i64: 1, 1024>}, {pipeline_mode = #tpu.pipeline_mode<synchronous>, transform_indices = @transform_3, window_bounds = array<i64: 1024, 512>}, {pipeline_mode = #tpu.pipeline_mode<synchronous>, transform_indices = @transform_4, window_bounds = array<i64: 1, 512>}, {pipeline_mode = #tpu.pipeline_mode<synchronous>, transform_indices = @transform_5, window_bounds = array<i64: 512, 512>}, {pipeline_mode = #tpu.pipeline_mode<synchronous>, transform_indices = @transform_6, window_bounds = array<i64: 1, 512>}, {pipeline_mode = #tpu.pipeline_mode<synchronous>, transform_indices = @transform_7, window_bounds = array<i64: 512, 128>}, {pipeline_mode = #tpu.pipeline_mode<synchronous>, transform_indices = @transform_8, window_bounds = array<i64: 1, 128>}, {pipeline_mode = #tpu.pipeline_mode<synchronous>, transform_indices = @transform_9, window_bounds = array<i64: 128, 128>}, {pipeline_mode = #tpu.pipeline_mode<synchronous>, transform_indices = @transform_10, window_bounds = array<i64: 1, 128>}, {transform_indices = @transform_11, window_bounds = array<i64: 8, 128>}]} {
    %c0 = arith.constant 0 : index
    %c0_0 = arith.constant 0 : index
    %0 = vector.load %arg1[%c0, %c0_0] : memref<8x128xbf16, #tpu.memory_space<vmem>>, vector<8x128xbf16>
    %c0_1 = arith.constant 0 : index
    %c0_2 = arith.constant 0 : index
    %1 = vector.load %arg2[%c0_1, %c0_2] : memref<128x1024xbf16, #tpu.memory_space<vmem>>, vector<128x1024xbf16>
    %cst = arith.constant dense<0.000000e+00> : vector<8x1024xf32>
    %2 = tpu.matmul %0, %1, %cst {dimension_numbers = #tpu.dot_dimension_numbers<[1], [0], [0], [1], [0, 0, 1, 1], [], []>} : vector<8x128xbf16>, vector<128x1024xbf16>, vector<8x1024xf32> -> vector<8x1024xf32>
    %c0_3 = arith.constant 0 : index
    %c0_4 = arith.constant 0 : index
    %3 = vector.load %arg3[%c0_3, %c0_4] : memref<1x1024xf32, #tpu.memory_space<vmem>>, vector<1x1024xf32>
    %4 = vector.broadcast %3 : vector<1x1024xf32> to vector<8x1024xf32>
    %5 = arith.addf %2, %4 : vector<8x1024xf32>
    %cst_5 = arith.constant 0.000000e+00 : f32
    %6 = vector.broadcast %cst_5 : f32 to vector<8x1024xf32>
    %7 = arith.maximumf %5, %6 : vector<8x1024xf32>
    %8 = arith.truncf %7 : vector<8x1024xf32> to vector<8x1024xbf16>
    %c0_6 = arith.constant 0 : index
    %c0_7 = arith.constant 0 : index
    %9 = vector.load %arg4[%c0_6, %c0_7] : memref<1024x512xbf16, #tpu.memory_space<vmem>>, vector<1024x512xbf16>
    %cst_8 = arith.constant dense<0.000000e+00> : vector<8x512xf32>
    %10 = tpu.matmul %8, %9, %cst_8 {dimension_numbers = #tpu.dot_dimension_numbers<[1], [0], [0], [1], [0, 0, 1, 1], [], []>} : vector<8x1024xbf16>, vector<1024x512xbf16>, vector<8x512xf32> -> vector<8x512xf32>
    %c0_9 = arith.constant 0 : index
    %c0_10 = arith.constant 0 : index
    %11 = vector.load %arg5[%c0_9, %c0_10] : memref<1x512xf32, #tpu.memory_space<vmem>>, vector<1x512xf32>
    %12 = vector.broadcast %11 : vector<1x512xf32> to vector<8x512xf32>
    %13 = arith.addf %10, %12 : vector<8x512xf32>
    %cst_11 = arith.constant 0.000000e+00 : f32
    %14 = vector.broadcast %cst_11 : f32 to vector<8x512xf32>
    %15 = arith.maximumf %13, %14 : vector<8x512xf32>
    %16 = arith.truncf %15 : vector<8x512xf32> to vector<8x512xbf16>
    %c0_12 = arith.constant 0 : index
    %c0_13 = arith.constant 0 : index
    %17 = vector.load %arg6[%c0_12, %c0_13] : memref<512x512xbf16, #tpu.memory_space<vmem>>, vector<512x512xbf16>
    %cst_14 = arith.constant dense<0.000000e+00> : vector<8x512xf32>
    %18 = tpu.matmul %16, %17, %cst_14 {dimension_numbers = #tpu.dot_dimension_numbers<[1], [0], [0], [1], [0, 0, 1, 1], [], []>} : vector<8x512xbf16>, vector<512x512xbf16>, vector<8x512xf32> -> vector<8x512xf32>
    %c0_15 = arith.constant 0 : index
    %c0_16 = arith.constant 0 : index
    %19 = vector.load %arg7[%c0_15, %c0_16] : memref<1x512xf32, #tpu.memory_space<vmem>>, vector<1x512xf32>
    %20 = vector.broadcast %19 : vector<1x512xf32> to vector<8x512xf32>
    %21 = arith.addf %18, %20 : vector<8x512xf32>
    %cst_17 = arith.constant 0.000000e+00 : f32
    %22 = vector.broadcast %cst_17 : f32 to vector<8x512xf32>
    %23 = arith.maximumf %21, %22 : vector<8x512xf32>
    %24 = arith.truncf %23 : vector<8x512xf32> to vector<8x512xbf16>
    %c0_18 = arith.constant 0 : index
    %c0_19 = arith.constant 0 : index
    %25 = vector.load %arg8[%c0_18, %c0_19] : memref<512x128xbf16, #tpu.memory_space<vmem>>, vector<512x128xbf16>
    %cst_20 = arith.constant dense<0.000000e+00> : vector<8x128xf32>
    %26 = tpu.matmul %24, %25, %cst_20 {dimension_numbers = #tpu.dot_dimension_numbers<[1], [0], [0], [1], [0, 0, 1, 1], [], []>} : vector<8x512xbf16>, vector<512x128xbf16>, vector<8x128xf32> -> vector<8x128xf32>
    %c0_21 = arith.constant 0 : index
    %c0_22 = arith.constant 0 : index
    %27 = vector.load %arg9[%c0_21, %c0_22] : memref<1x128xf32, #tpu.memory_space<vmem>>, vector<1x128xf32>
    %28 = vector.broadcast %27 : vector<1x128xf32> to vector<8x128xf32>
    %29 = arith.addf %26, %28 : vector<8x128xf32>
    %cst_23 = arith.constant 0.000000e+00 : f32
    %30 = vector.broadcast %cst_23 : f32 to vector<8x128xf32>
    %31 = arith.maximumf %29, %30 : vector<8x128xf32>
    %32 = arith.truncf %31 : vector<8x128xf32> to vector<8x128xbf16>
    %c0_24 = arith.constant 0 : index
    %c0_25 = arith.constant 0 : index
    %33 = vector.load %arg10[%c0_24, %c0_25] : memref<128x128xbf16, #tpu.memory_space<vmem>>, vector<128x128xbf16>
    %cst_26 = arith.constant dense<0.000000e+00> : vector<8x128xf32>
    %34 = tpu.matmul %32, %33, %cst_26 {dimension_numbers = #tpu.dot_dimension_numbers<[1], [0], [0], [1], [0, 0, 1, 1], [], []>} : vector<8x128xbf16>, vector<128x128xbf16>, vector<8x128xf32> -> vector<8x128xf32>
    %c0_27 = arith.constant 0 : index
    %c0_28 = arith.constant 0 : index
    %35 = vector.load %arg11[%c0_27, %c0_28] : memref<1x128xf32, #tpu.memory_space<vmem>>, vector<1x128xf32>
    %36 = vector.broadcast %35 : vector<1x128xf32> to vector<8x128xf32>
    %37 = arith.addf %34, %36 : vector<8x128xf32>
    %c0_29 = arith.constant 0 : index
    %c0_30 = arith.constant 0 : index
    %38 = vector.load %arg12[%c0_29, %c0_30] : memref<8x128xf32, #tpu.memory_space<vmem>>, vector<8x128xf32>
    tpu.vector_store %arg12[%c0_29, %c0_30], %37 {strides = array<i32>} : memref<8x128xf32, #tpu.memory_space<vmem>>, vector<8x128xf32>,
    return
  }
  func.func @transform_0(%arg0: i32) -> (i32, i32) {
    %c0_i32 = arith.constant 0 : i32
    %c0_i32_0 = arith.constant 0 : i32
    return %arg0, %c0_i32 : i32, i32
  }
  func.func @transform_1(%arg0: i32) -> (i32, i32) {
    %c0_i32 = arith.constant 0 : i32
    %c0_i32_0 = arith.constant 0 : i32
    %c0_i32_1 = arith.constant 0 : i32
    return %c0_i32, %c0_i32_0 : i32, i32
  }
  func.func @transform_2(%arg0: i32) -> (i32, i32) {
    %c0_i32 = arith.constant 0 : i32
    %c0_i32_0 = arith.constant 0 : i32
    %c0_i32_1 = arith.constant 0 : i32
    return %c0_i32, %c0_i32_0 : i32, i32
  }
  func.func @transform_3(%arg0: i32) -> (i32, i32) {
    %c0_i32 = arith.constant 0 : i32
    %c0_i32_0 = arith.constant 0 : i32
    %c0_i32_1 = arith.constant 0 : i32
    return %c0_i32, %c0_i32_0 : i32, i32
  }
  func.func @transform_4(%arg0: i32) -> (i32, i32) {
    %c0_i32 = arith.constant 0 : i32
    %c0_i32_0 = arith.constant 0 : i32
    %c0_i32_1 = arith.constant 0 : i32
    return %c0_i32, %c0_i32_0 : i32, i32
  }
  func.func @transform_5(%arg0: i32) -> (i32, i32) {
    %c0_i32 = arith.constant 0 : i32
    %c0_i32_0 = arith.constant 0 : i32
    %c0_i32_1 = arith.constant 0 : i32
    return %c0_i32, %c0_i32_0 : i32, i32
  }
  func.func @transform_6(%arg0: i32) -> (i32, i32) {
    %c0_i32 = arith.constant 0 : i32
    %c0_i32_0 = arith.constant 0 : i32
    %c0_i32_1 = arith.constant 0 : i32
    return %c0_i32, %c0_i32_0 : i32, i32
  }
  func.func @transform_7(%arg0: i32) -> (i32, i32) {
    %c0_i32 = arith.constant 0 : i32
    %c0_i32_0 = arith.constant 0 : i32
    %c0_i32_1 = arith.constant 0 : i32
    return %c0_i32, %c0_i32_0 : i32, i32
  }
  func.func @transform_8(%arg0: i32) -> (i32, i32) {
    %c0_i32 = arith.constant 0 : i32
    %c0_i32_0 = arith.constant 0 : i32
    %c0_i32_1 = arith.constant 0 : i32
    return %c0_i32, %c0_i32_0 : i32, i32
  }
  func.func @transform_9(%arg0: i32) -> (i32, i32) {
    %c0_i32 = arith.constant 0 : i32
    %c0_i32_0 = arith.constant 0 : i32
    %c0_i32_1 = arith.constant 0 : i32
    return %c0_i32, %c0_i32_0 : i32, i32
  }
  func.func @transform_10(%arg0: i32) -> (i32, i32) {
    %c0_i32 = arith.constant 0 : i32
    %c0_i32_0 = arith.constant 0 : i32
    %c0_i32_1 = arith.constant 0 : i32
    return %c0_i32, %c0_i32_0 : i32, i32
  }
  func.func @transform_11(%arg0: i32) -> (i32, i32) {
    %c0_i32 = arith.constant 0 : i32
    %c0_i32_0 = arith.constant 0 : i32
    return %arg0, %c0_i32 : i32, i32
  }
}

</mosaic_0001>

<bundles_post_ra>
// kernel: location_module_forward.1
= control target key start
LH: loop header
LB: loop body
LE: loop exit
PB: predicated region body
PF: predicated region fallthrough
CT: control target
= control target key end

     0   :  { %16 = vsyncpa [#allocation3], 0  ;;  %s5569_s0 = inlined_call_operand.vmem [shape: bf16[8,128], index: 0, kind: input, shape index: {}]   ;;  %s5570_s1 = inlined_call_operand.hbm [shape: bf16[128,1024], index: 1, kind: input, shape index: {}]   ;;  %s5571_s2 = inlined_call_operand.vmem [shape: f32[1,1024], index: 2, kind: input, shape index: {}]   ;;  %s5572_s3 = inlined_call_operand.hbm [shape: bf16[1024,512], index: 3, kind: input, shape index: {}]   ;;  %s5573_s4 = inlined_call_operand.vmem [shape: f32[1,512], index: 4, kind: input, shape index: {}]   ;;  %s5574_s5 = inlined_call_operand.hbm [shape: bf16[512,512], index: 5, kind: input, shape index: {}]   ;;  %s5575_s6 = inlined_call_operand.vmem [shape: f32[1,512], index: 6, kind: input, shape index: {}]   ;;  %s5576_s7 = inlined_call_operand.hbm [shape: bf16[512,128], index: 7, kind: input, shape index: {}]   ;;  %s5577_s8 = inlined_call_operand.vmem [shape: f32[1,128], index: 8, kind: input, shape index: {}]   ;;  %s5578_s9 = inlined_call_operand.hbm [shape: bf16[128,128], index: 9, kind: input, shape index: {}]   ;;  %s5579_s10 = inlined_call_operand.vmem [shape: f32[1,128], index: 10, kind: input, shape index: {}]   ;;  %s5580_s11 = inlined_call_operand.vmem [shape: f32[8,128], index: 11, kind: output, shape index: {}]  }
   0x1   :  { %17 = vsyncpa [#allocation5], 0 }
   0x2   :  { %18 = vsyncpa [#allocation8], 0  ;;  %s5333_s17 = smov [#allocation4]  }
   0x3   :  { %s40_s18 = sshll.u32 %s5333_s17, 4  ;;  %s41_s18 = int_to_ptr.vmem [resolvable:$true] %s40_s18 }
   0x4   :  { %s5235_s19 = scalar_lea.vmem %s41_s18, 32768  ;;  %p5240_p1 = scmp.lt.s32.totalorder %s41_s18, %s41_s18 }
   0x5   :  { %p5236_p0 = scmp.ne.s32.totalorder %s41_s18, %s5235_s19  ;;  %p5241_p2 = scmp.lt.s32.totalorder %s5235_s19, %s5235_s19 }
   0x7   :  { %p5242_p3 = por %p5241_p2, %p5240_p1 }
   0x9   :  { %p5243_p4 = pnand %p5242_p3, %p5236_p0 }
   0xb   :  { %5246 = shalt.err (!%p5243_p4)
}
   0xc   :  { %s5334_s20 = smov 256   ;;  %s5335_s21 = smov 16  }
   0xd   :  { %46 = dma.hbm_to_vmem [thread:$0]  %s5572_s3, 32768, %s41_s18, [#allocation5], %s5334_s20, %s5334_s20, %s5335_s21  }
   0xe   :  { %s5336_s24 = smov [#allocation7]  }
   0xf   :  { %s68_s25 = sshll.u32 %s5336_s24, 4  ;;  %s69_s25 = int_to_ptr.vmem [resolvable:$true] %s68_s25 }
  0x10   :  { %s5255_s26 = scalar_lea.vmem %s69_s25, 4096  ;;  %p5260_p6 = scmp.lt.s32.totalorder %s69_s25, %s69_s25 }
  0x11   :  { %p5256_p5 = scmp.ne.s32.totalorder %s69_s25, %s5255_s26  ;;  %p5261_p7 = scmp.lt.s32.totalorder %s5255_s26, %s5255_s26 }
  0x13   :  { %p5262_p8 = por %p5261_p7, %p5260_p6 }
  0x15   :  { %p5263_p9 = pnand %p5262_p8, %p5256_p5 }
  0x17   :  { %5266 = shalt.err (!%p5263_p9)
}
  0x18   :  { %s5337_s27 = smov 64   ;;  %s5338_s28 = smov 4  }
  0x19   :  { %74 = dma.hbm_to_vmem [thread:$0]  %s5576_s7, 4096, %s69_s25, [#allocation8], %s5337_s27, %s5337_s27, %s5338_s28  }
  0x1a   :  { %s5339_s3 = smov [#allocation2]  }
  0x1b   :  { %s26_s12 = sshll.u32 %s5339_s3, 4  ;;  %s27_s12 = int_to_ptr.vmem [resolvable:$true] %s26_s12 }
  0x1c   :  { %s5275_s13 = scalar_lea.vmem %s27_s12, 8192  ;;  %p5280_p11 = scmp.lt.s32.totalorder %s27_s12, %s27_s12 }
  0x1d   :  { %p5276_p10 = scmp.ne.s32.totalorder %s27_s12, %s5275_s13  ;;  %p5281_p12 = scmp.lt.s32.totalorder %s5275_s13, %s5275_s13 }
  0x1f   :  { %p5282_p13 = por %p5281_p12, %p5280_p11 }
  0x21   :  { %p5283_p0 = pnand %p5282_p13, %p5276_p10 }
  0x23   :  { %5286 = shalt.err (!%p5283_p0)
}
  0x24   :  { %s5340_s14 = smov 512   ;;  %s5341_s15 = smov 32  }
  0x25   :  { %32 = dma.hbm_to_vmem [thread:$0]  %s5570_s1, 8192, %s27_s12, [#allocation3], %s5340_s14, %s5340_s14, %s5341_s15  }
  0x26   :  { %s5342_s18 = smov [#allocation6]   ;;  %s5343_s7 = smov [#allocation9]  }
  0x27   :  { %s54_s19 = sshll.u32 %s5342_s18, 4  ;;  %s82_s22 = sshll.u32 %s5343_s7, 4  ;;  %s55_s19 = int_to_ptr.vmem [resolvable:$true] %s54_s19  ;;  %s83_s22 = int_to_ptr.vmem [resolvable:$true] %s82_s22 }
  0x28   :  { %s5295_s23 = scalar_lea.vmem %s55_s19, 16384  ;;  %p5300_p2 = scmp.lt.s32.totalorder %s55_s19, %s55_s19 }
  0x29   :  { %p5296_p1 = scmp.ne.s32.totalorder %s55_s19, %s5295_s23  ;;  %p5301_p3 = scmp.lt.s32.totalorder %s5295_s23, %s5295_s23 }
  0x2b   :  { %p5302_p4 = por %p5301_p3, %p5300_p2 }
  0x2d   :  { %p5303_p5 = pnand %p5302_p4, %p5296_p1 }
  0x2f   :  { %5306 = shalt.err (!%p5303_p5)
}
  0x30   :  { %60 = dma.hbm_to_vmem [thread:$0]  %s5574_s5, 16384, %s55_s19, [#allocation5], %s5334_s20, %s5334_s20, %s5335_s21  }
  0x31   :  { %s5315_s1 = scalar_lea.vmem %s83_s22, 1024  ;;  %p5320_p7 = scmp.lt.s32.totalorder %s83_s22, %s83_s22 }
  0x32   :  { %p5316_p6 = scmp.ne.s32.totalorder %s83_s22, %s5315_s1  ;;  %p5321_p8 = scmp.lt.s32.totalorder %s5315_s1, %s5315_s1 }
  0x34   :  { %p5322_p9 = por %p5321_p8, %p5320_p7 }
  0x36   :  { %p5323_p10 = pnand %p5322_p9, %p5316_p6 }
  0x38   :  { %5326 = shalt.err (!%p5323_p10)
}
  0x39   :  { %88 = dma.hbm_to_vmem [thread:$0]  %s5578_s9, 1024, %s83_s22, [#allocation8], %s5337_s27, %s5337_s27, %s5338_s28  }
  0x3a   :  { %5327 = dma.done.wait [#allocation3], 8192  }
  0x3b   :  { %5328 = vsyncadd [#allocation3], 4294959104 }
  0x3c   :  { %5329 = dma.done.wait [#allocation5], 49152  }
  0x3d   :  { %5330 = vsyncadd [#allocation5], 4294918144 }
  0x3e   :  { %5331 = dma.done.wait [#allocation8], 5120  }
  0x3f   :  { %5332 = vsyncadd [#allocation8], 4294962176  ;;  %v5344_v0 = vmov 0   ;;  %v164_v1 = vld [vmem:[#allocation2 + $0x1c0] sm:$0xff]  ;;  %v165_v3 = vld [vmem:[#allocation2 + $0x1c8] sm:$0xff]  ;;  %vm5346_vm0 = vmmov 0  }
  0x40   :  { %566 = vmatprep.mubr.bf16.mxu0 %v5344_v0  ;;  %607 = vmatprep.mubr.bf16.mxu1 %v5344_v0  ;;  %v168_v2 = vld [vmem:[#allocation2 + $0x1e0] sm:$0xff]  ;;  %v169_v5 = vld [vmem:[#allocation2 + $0x1e8] sm:$0xff]  ;;  %v166_v62 = vld [vmem:[#allocation2 + $0x1d0] sm:$0xff] }
  0x41   :  { %v4091_v4 = vcombine.high %v164_v1, %v168_v2  ;;  %v4090_v6 = vcombine.low %v164_v1, %v168_v2  ;;  %v156_v7 = vld [vmem:[#allocation2 + $0x180] sm:$0xff]  ;;  %v4093_v9 = vcombine.high %v165_v3, %v169_v5  ;;  %v4092_v10 = vcombine.low %v165_v3, %v169_v5  ;;  %v157_v12 = vld [vmem:[#allocation2 + $0x188] sm:$0xff]  ;;  %v170_v1 = vld [vmem:[#allocation2 + $0x1f0] sm:$0xff] }
  0x42   :  { %v160_v8 = vld [vmem:[#allocation2 + $0x1a0] sm:$0xff]  ;;  %v161_v13 = vld [vmem:[#allocation2 + $0x1a8] sm:$0xff]  ;;  %v167_v2 = vld [vmem:[#allocation2 + $0x1d8] sm:$0xff] }
  0x43   :  { %v4083_v11 = vcombine.high %v156_v7, %v160_v8  ;;  %v148_v14 = vld [vmem:[#allocation2 + $0x140] sm:$0xff]  ;;  %534 = vmatprep.subr.bf16.mxu0 %v4091_v4  ;;  %v4085_v15 = vcombine.high %v157_v12, %v161_v13  ;;  %v149_v17 = vld [vmem:[#allocation2 + $0x148] sm:$0xff]  ;;  %575 = vmatprep.subr.bf16.mxu1 %v4093_v9  ;;  %v4082_v19 = vcombine.low %v156_v7, %v160_v8  ;;  %v171_v3 = vld [vmem:[#allocation2 + $0x1f8] sm:$0xff] }
  0x44   :  { %v152_v16 = vld [vmem:[#allocation2 + $0x160] sm:$0xff]  ;;  %v153_v18 = vld [vmem:[#allocation2 + $0x168] sm:$0xff]  ;;  %535 = vmatpush1.bf16.msra.mxu0 %v4090_v6  ;;  %576 = vmatpush1.bf16.msra.mxu1 %v4092_v10  ;;  %v4084_v20 = vcombine.low %v157_v12, %v161_v13  ;;  %v4095_v6 = vcombine.high %v166_v62, %v170_v1  ;;  %v158_v7 = vld [vmem:[#allocation2 + $0x190] sm:$0xff]  ;;  %v4097_v8 = vcombine.high %v167_v2, %v171_v3 }
  0x45   :  { %536 = vmatprep.subr.bf16.mxu0 %v4083_v11  ;;  %v4075_v21 = vcombine.high %v148_v14, %v152_v16  ;;  %577 = vmatprep.subr.bf16.mxu1 %v4085_v15  ;;  %v4077_v22 = vcombine.high %v149_v17, %v153_v18  ;;  %v140_v23 = vld [vmem:[#allocation2 + $0x100] sm:$0xff]  ;;  %v141_v25 = vld [vmem:[#allocation2 + $0x108] sm:$0xff]  ;;  %v4074_v27 = vcombine.low %v148_v14, %v152_v16  ;;  %v162_v9 = vld [vmem:[#allocation2 + $0x1b0] sm:$0xff] }
  0x46   :  { %v144_v24 = vld [vmem:[#allocation2 + $0x120] sm:$0xff]  ;;  %v145_v26 = vld [vmem:[#allocation2 + $0x128] sm:$0xff]  ;;  %v4076_v28 = vcombine.low %v149_v17, %v153_v18  ;;  %v159_v10 = vld [vmem:[#allocation2 + $0x198] sm:$0xff]  ;;  %v4094_v13 = vcombine.low %v166_v62, %v170_v1  ;;  %v4096_v14 = vcombine.low %v167_v2, %v171_v3  ;;  %v4087_v15 = vcombine.high %v158_v7, %v162_v9 }
  0x47   :  { %v4067_v29 = vcombine.high %v140_v23, %v144_v24  ;;  %v4069_v30 = vcombine.high %v141_v25, %v145_v26  ;;  %v132_v31 = vld [vmem:[#allocation2 + $0xc0] sm:$0xff]  ;;  %v133_v33 = vld [vmem:[#allocation2 + $0xc8] sm:$0xff]  ;;  %v4066_v35 = vcombine.low %v140_v23, %v144_v24  ;;  %v4068_v36 = vcombine.low %v141_v25, %v145_v26  ;;  %v163_v11 = vld [vmem:[#allocation2 + $0x1b8] sm:$0xff] }
  0x48   :  { %537 = vmatpush1.bf16.msra.mxu0 %v4082_v19  ;;  %578 = vmatpush1.bf16.msra.mxu1 %v4084_v20  ;;  %v136_v32 = vld [vmem:[#allocation2 + $0xe0] sm:$0xff]  ;;  %v137_v34 = vld [vmem:[#allocation2 + $0xe8] sm:$0xff]  ;;  %v150_v16 = vld [vmem:[#allocation2 + $0x150] sm:$0xff]  ;;  %v4089_v17 = vcombine.high %v159_v10, %v163_v11 }
  0x49   :  { %538 = vmatprep.subr.bf16.mxu0 %v4075_v21  ;;  %579 = vmatprep.subr.bf16.mxu1 %v4077_v22  ;;  %v4059_v37 = vcombine.high %v132_v31, %v136_v32  ;;  %v4061_v38 = vcombine.high %v133_v33, %v137_v34  ;;  %v124_v39 = vld [vmem:[#allocation2 + $0x80] sm:$0xff]  ;;  %v125_v41 = vld [vmem:[#allocation2 + $0x88] sm:$0xff]  ;;  %v4058_v43 = vcombine.low %v132_v31, %v136_v32  ;;  %v154_v18 = vld [vmem:[#allocation2 + $0x170] sm:$0xff] }
  0x4a   :  { %v128_v40 = vld [vmem:[#allocation2 + $0xa0] sm:$0xff]  ;;  %v129_v42 = vld [vmem:[#allocation2 + $0xa8] sm:$0xff]  ;;  %v4060_v44 = vcombine.low %v133_v33, %v137_v34  ;;  %v151_v19 = vld [vmem:[#allocation2 + $0x158] sm:$0xff]  ;;  %v4086_v21 = vcombine.low %v158_v7, %v162_v9  ;;  %v4088_v22 = vcombine.low %v159_v10, %v163_v11  ;;  %v4079_v23 = vcombine.high %v150_v16, %v154_v18 }
  0x4b   :  { %v4051_v45 = vcombine.high %v124_v39, %v128_v40  ;;  %v4053_v46 = vcombine.high %v125_v41, %v129_v42  ;;  %v116_v47 = vld [vmem:[#allocation2 + $0x40] sm:$0xff]  ;;  %v117_v49 = vld [vmem:[#allocation2 + $0x48] sm:$0xff]  ;;  %v4050_v51 = vcombine.low %v124_v39, %v128_v40  ;;  %v4052_v52 = vcombine.low %v125_v41, %v129_v42  ;;  %v155_v20 = vld [vmem:[#allocation2 + $0x178] sm:$0xff] }
  0x4c   :  { %539 = vmatpush1.bf16.msra.mxu0 %v4074_v27  ;;  %580 = vmatpush1.bf16.msra.mxu1 %v4076_v28  ;;  %v120_v48 = vld [vmem:[#allocation2 + $0x60] sm:$0xff]  ;;  %v121_v50 = vld [vmem:[#allocation2 + $0x68] sm:$0xff]  ;;  %v142_v24 = vld [vmem:[#allocation2 + $0x110] sm:$0xff]  ;;  %v4081_v25 = vcombine.high %v151_v19, %v155_v20 }
  0x4d   :  { %540 = vmatprep.subr.bf16.mxu0 %v4067_v29  ;;  %581 = vmatprep.subr.bf16.mxu1 %v4069_v30  ;;  %v4043_v53 = vcombine.high %v116_v47, %v120_v48  ;;  %v108_v54 = vld [vmem:[#allocation2] sm:$0xff]  ;;  %v4045_v55 = vcombine.high %v117_v49, %v121_v50  ;;  %v109_v57 = vld [vmem:[#allocation2 + $0x8] sm:$0xff]  ;;  %v4042_v59 = vcombine.low %v116_v47, %v120_v48  ;;  %v146_v26 = vld [vmem:[#allocation2 + $0x130] sm:$0xff] }
  0x4e   :  { %v112_v56 = vld [vmem:[#allocation2 + $0x20] sm:$0xff]  ;;  %v113_v58 = vld [vmem:[#allocation2 + $0x28] sm:$0xff]  ;;  %v4044_v60 = vcombine.low %v117_v49, %v121_v50  ;;  %v143_v27 = vld [vmem:[#allocation2 + $0x118] sm:$0xff]  ;;  %v4078_v29 = vcombine.low %v150_v16, %v154_v18  ;;  %v4080_v30 = vcombine.low %v151_v19, %v155_v20  ;;  %v4071_v31 = vcombine.high %v142_v24, %v146_v26 }
  0x4f   :  { %v4035_v61 = vcombine.high %v108_v54, %v112_v56  ;;  %v4037_v63 = vcombine.high %v109_v57, %v113_v58  ;;  %v4034_v4 = vcombine.low %v108_v54, %v112_v56  ;;  %v4036_v5 = vcombine.low %v109_v57, %v113_v58  ;;  %v5439_v12 = vld [vmem:[%s5569_s0] sm:$0xf]  ;;  %v147_v28 = vld [vmem:[#allocation2 + $0x138] sm:$0xff]  ;;  %v134_v32 = vld [vmem:[#allocation2 + $0xd0] sm:$0xff] }
  0x50   :  { %541 = vmatpush1.bf16.msra.mxu0 %v4066_v35  ;;  %582 = vmatpush1.bf16.msra.mxu1 %v4068_v36  ;;  %v4073_v33 = vcombine.high %v143_v27, %v147_v28  ;;  %v138_v34 = vld [vmem:[#allocation2 + $0xf0] sm:$0xff]  ;;  %v135_v35 = vld [vmem:[#allocation2 + $0xd8] sm:$0xff] }
  0x51   :  { %542 = vmatprep.subr.bf16.mxu0 %v4059_v37  ;;  %583 = vmatprep.subr.bf16.mxu1 %v4061_v38  ;;  %v139_v36 = vld [vmem:[#allocation2 + $0xf8] sm:$0xff]  ;;  %v4070_v37 = vcombine.low %v142_v24, %v146_v26  ;;  %v4072_v38 = vcombine.low %v143_v27, %v147_v28  ;;  %v4063_v39 = vcombine.high %v134_v32, %v138_v34  ;;  %v126_v40 = vld [vmem:[#allocation2 + $0x90] sm:$0xff] }
  0x52   :  { %v130_v41 = vld [vmem:[#allocation2 + $0xb0] sm:$0xff]  ;;  %v127_v42 = vld [vmem:[#allocation2 + $0x98] sm:$0xff] }
  0x53   :  { %v118_v47 = vld [vmem:[#allocation2 + $0x50] sm:$0xff]  ;;  %v119_v50 = vld [vmem:[#allocation2 + $0x58] sm:$0xff] }
  0x54   :  { %543 = vmatpush1.bf16.msra.mxu0 %v4058_v43  ;;  %584 = vmatpush1.bf16.msra.mxu1 %v4060_v44  ;;  %v131_v43 = vld [vmem:[#allocation2 + $0xb8] sm:$0xff]  ;;  %v4062_v44 = vcombine.low %v134_v32, %v138_v34  ;;  %v122_v49 = vld [vmem:[#allocation2 + $0x70] sm:$0xff] }
  0x55   :  { %544 = vmatprep.subr.bf16.mxu0 %v4051_v45  ;;  %585 = vmatprep.subr.bf16.mxu1 %v4053_v46  ;;  %v4064_v45 = vcombine.low %v135_v35, %v139_v36  ;;  %v4055_v46 = vcombine.high %v126_v40, %v130_v41  ;;  %v4057_v48 = vcombine.high %v127_v42, %v131_v43  ;;  %v114_v57 = vld [vmem:[#allocation2 + $0x30] sm:$0xff]  ;;  %v111_v58 = vld [vmem:[#allocation2 + $0x18] sm:$0xff] }
  0x56   :  { %v4047_v54 = vcombine.high %v118_v47, %v122_v49  ;;  %v4613_v1 = vld [vmem:[#allocation4 + $0xe4] ss:$16 sps:$4 sm:$0xff]   ;;  %v4617_v9 = vld [vmem:[#allocation4 + $0xc0] ss:$16 sps:$4 sm:$0xff]  }
  0x57   :  { %v4616_v3 = vld [vmem:[#allocation4 + $0x2e4] ss:$16 sps:$4 sm:$0xff]   ;;  %v4620_v10 = vld [vmem:[#allocation4 + $0x2c0] ss:$16 sps:$4 sm:$0xff]  }
  0x58   :  { %545 = vmatpush1.bf16.msra.mxu0 %v4050_v51  ;;  %586 = vmatpush1.bf16.msra.mxu1 %v4052_v52  ;;  %v123_v51 = vld [vmem:[#allocation2 + $0x78] sm:$0xff]  ;;  %v4054_v52 = vcombine.low %v126_v40, %v130_v41  ;;  %v4619_v7 = vld [vmem:[#allocation4 + $0xc4] ss:$16 sps:$4 sm:$0xff]   ;;  %v4629_v18 = vld [vmem:[#allocation4 + $0x80] ss:$16 sps:$4 sm:$0xff]  }
  0x59   :  { %546 = vmatprep.subr.bf16.mxu0 %v4043_v53  ;;  %587 = vmatprep.subr.bf16.mxu1 %v4045_v55  ;;  %v4056_v53 = vcombine.low %v127_v42, %v131_v43  ;;  %v110_v55 = vld [vmem:[#allocation2 + $0x10] sm:$0xff]  ;;  %v4049_v56 = vcombine.high %v119_v50, %v123_v51 }
  0x5a   :  { %v4039_v62 = vcombine.high %v110_v55, %v114_v57  ;;  %v4038_v2 = vcombine.low %v110_v55, %v114_v57  ;;  %v4625_v11 = vld [vmem:[#allocation4 + $0xa4] ss:$16 sps:$4 sm:$0xff]   ;;  %v4632_v19 = vld [vmem:[#allocation4 + $0x280] ss:$16 sps:$4 sm:$0xff]  }
  0x5b   :  { %v4631_v16 = vld [vmem:[#allocation4 + $0x84] ss:$16 sps:$4 sm:$0xff]   ;;  %v4644_v26 = vld [vmem:[#allocation4 + $0x240] ss:$16 sps:$4 sm:$0xff]  }
  0x5c   :  { %547 = vmatpush1.bf16.msra.mxu0 %v4042_v59  ;;  %588 = vmatpush1.bf16.msra.mxu1 %v4044_v60  ;;  %v115_v59 = vld [vmem:[#allocation2 + $0x38] sm:$0xff]  ;;  %v4046_v60 = vcombine.low %v118_v47, %v122_v49  ;;  %v4637_v20 = vld [vmem:[#allocation4 + $0x64] ss:$16 sps:$4 sm:$0xff]   ;;  %v4656_v34 = vld [vmem:[#allocation4 + $0x200] ss:$16 sps:$4 sm:$0xff]  }
  0x5d   :  { %548 = vmatprep.subr.bf16.mxu0 %v4035_v61  ;;  %589 = vmatprep.subr.bf16.mxu1 %v4037_v63  ;;  %v4048_v61 = vcombine.low %v119_v50, %v123_v51  ;;  %v4041_v63 = vcombine.high %v111_v58, %v115_v59  ;;  %v4646_v24 = vld [vmem:[#allocation4 + $0x244] ss:$16 sps:$4 sm:$0xff]   ;;  %v4668_v41 = vld [vmem:[#allocation4 + $0x3c0] ss:$16 sps:$4 sm:$0xff]  }
  0x5e   :  { %v4649_v27 = vld [vmem:[#allocation4 + $0x24] ss:$16 sps:$4 sm:$0xff]   ;;  %v4680_v49 = vld [vmem:[#allocation4 + $0x380] ss:$16 sps:$4 sm:$0xff]  }
  0x5f   :  { %v4652_v28 = vld [vmem:[#allocation4 + $0x224] ss:$16 sps:$4 sm:$0xff]   ;;  %v4692_v57 = vld [vmem:[#allocation4 + $0x340] ss:$16 sps:$4 sm:$0xff]  }
  0x60   :  { %549 = vmatpush1.bf16.msra.mxu0 %v4034_v4  ;;  %590 = vmatpush1.bf16.msra.mxu1 %v4036_v5  ;;  %v4040_v4 = vcombine.low %v111_v58, %v115_v59  ;;  %v4611_v5 = vld [vmem:[#allocation4 + $0xe0] ss:$16 sps:$4 sm:$0xff]   ;;  %v4658_v32 = vld [vmem:[#allocation4 + $0x204] ss:$16 sps:$4 sm:$0xff]  }
  0x61   :  { %616 = vmatprep.subr.bf16.mxu0 %v4095_v6  ;;  %657 = vmatprep.subr.bf16.mxu1 %v4097_v8  ;;  %v4614_v6 = vld [vmem:[#allocation4 + $0x2e0] ss:$16 sps:$4 sm:$0xff]   ;;  %v4622_v8 = vld [vmem:[#allocation4 + $0x2c4] ss:$16 sps:$4 sm:$0xff]  }
  0x62   :  { %v4670_v40 = vld [vmem:[#allocation4 + $0x3c4] ss:$16 sps:$4 sm:$0xff]  }
  0x63   :  { %567 = vmatmul.mubr.bf16.vlgmr.msra.gmra.mxu0 %v5439_v12  ;;  %608 = vmatmul.mubr.bf16.vlgmr.msra.gmra.mxu1 %v5439_v12  ;;  %v4673_v42 = vld [vmem:[#allocation4 + $0x1a4] ss:$16 sps:$4 sm:$0xff]  }
  0x64   :  { %617 = vmatpush1.bf16.msra.mxu0 %v4094_v13  ;;  %658 = vmatpush1.bf16.msra.mxu1 %v4096_v14  ;;  %v4628_v13 = vld [vmem:[#allocation4 + $0x2a4] ss:$16 sps:$4 sm:$0xff]   ;;  %v4623_v14 = vld [vmem:[#allocation4 + $0xa0] ss:$16 sps:$4 sm:$0xff]  }
  0x65   :  { %618 = vmatprep.subr.bf16.mxu0 %v4087_v15  ;;  %659 = vmatprep.subr.bf16.mxu1 %v4089_v17  ;;  %v4626_v15 = vld [vmem:[#allocation4 + $0x2a0] ss:$16 sps:$4 sm:$0xff]   ;;  %v4634_v17 = vld [vmem:[#allocation4 + $0x284] ss:$16 sps:$4 sm:$0xff]  }
  0x66   :  { %648 = vmatprep.mubr.bf16.mxu0 %v5344_v0  ;;  %689 = vmatprep.mubr.bf16.mxu1 %v5344_v0  ;;  %v4065_v0 = vcombine.high %v135_v35, %v139_v36  ;;  %v4661_v35 = vld [vmem:[#allocation4 + $0x1e4] ss:$16 sps:$4 sm:$0xff]  }
  0x67   :  { %v4664_v36 = vld [vmem:[#allocation4 + $0x3e4] ss:$16 sps:$4 sm:$0xff]  }
  0x68   :  { %619 = vmatpush1.bf16.msra.mxu0 %v4086_v21  ;;  %660 = vmatpush1.bf16.msra.mxu1 %v4088_v22  ;;  %v4640_v21 = vld [vmem:[#allocation4 + $0x264] ss:$16 sps:$4 sm:$0xff]   ;;  %v4638_v22 = vld [vmem:[#allocation4 + $0x260] ss:$16 sps:$4 sm:$0xff]  }
  0x69   :  { %620 = vmatprep.subr.bf16.mxu0 %v4079_v23  ;;  %661 = vmatprep.subr.bf16.mxu1 %v4081_v25  ;;  %v4643_v23 = vld [vmem:[#allocation4 + $0x44] ss:$16 sps:$4 sm:$0xff]   ;;  %v4641_v25 = vld [vmem:[#allocation4 + $0x40] ss:$16 sps:$4 sm:$0xff]  }
  0x6a   :  { %v4676_v43 = vld [vmem:[#allocation4 + $0x3a4] ss:$16 sps:$4 sm:$0xff]  }
  0x6b   :  { %v4682_v47 = vld [vmem:[#allocation4 + $0x384] ss:$16 sps:$4 sm:$0xff]  }
  0x6c   :  { %621 = vmatpush1.bf16.msra.mxu0 %v4078_v29  ;;  %662 = vmatpush1.bf16.msra.mxu1 %v4080_v30  ;;  %v4647_v29 = vld [vmem:[#allocation4 + $0x20] ss:$16 sps:$4 sm:$0xff]   ;;  %v4685_v50 = vld [vmem:[#allocation4 + $0x164] ss:$16 sps:$4 sm:$0xff]  }
  0x6d   :  { %622 = vmatprep.subr.bf16.mxu0 %v4071_v31  ;;  %663 = vmatprep.subr.bf16.mxu1 %v4073_v33  ;;  %v4650_v30 = vld [vmem:[#allocation4 + $0x220] ss:$16 sps:$4 sm:$0xff]   ;;  %v4655_v31 = vld [vmem:[#allocation4 + $0x4] ss:$16 sps:$4 sm:$0xff]  }
  0x6e   :  { %v4653_v33 = vld [vmem:[#allocation4] ss:$16 sps:$4 sm:$0xff]   ;;  %v4688_v51 = vld [vmem:[#allocation4 + $0x364] ss:$16 sps:$4 sm:$0xff]  }
  0x6f   :  { %v4694_v55 = vld [vmem:[#allocation4 + $0x344] ss:$16 sps:$4 sm:$0xff]  }
  0x70   :  { %623 = vmatpush1.bf16.msra.mxu0 %v4070_v37  ;;  %664 = vmatpush1.bf16.msra.mxu1 %v4072_v38  ;;  %v4659_v37 = vld [vmem:[#allocation4 + $0x1e0] ss:$16 sps:$4 sm:$0xff]   ;;  %v4697_v58 = vld [vmem:[#allocation4 + $0x124] ss:$16 sps:$4 sm:$0xff]  }
  0x71   :  { %624 = vmatprep.subr.bf16.mxu0 %v4063_v39  ;;  %665 = vmatprep.subr.bf16.mxu1 %v4065_v0  ;;  %v4662_v38 = vld [vmem:[#allocation4 + $0x3e0] ss:$16 sps:$4 sm:$0xff]   ;;  %v4667_v39 = vld [vmem:[#allocation4 + $0x1c4] ss:$16 sps:$4 sm:$0xff]  }
  0x72   :  { %v4665_v0 = vld [vmem:[#allocation4 + $0x1c0] ss:$16 sps:$4 sm:$0xff]   ;;  %v4700_v59 = vld [vmem:[#allocation4 + $0x324] ss:$16 sps:$4 sm:$0xff]  }
  0x74   :  { %625 = vmatpush1.bf16.msra.mxu0 %v4062_v44  ;;  %666 = vmatpush1.bf16.msra.mxu1 %v4064_v45  ;;  %v4671_v44 = vld [vmem:[#allocation4 + $0x1a0] ss:$16 sps:$4 sm:$0xff]  }
  0x75   :  { %626 = vmatprep.subr.bf16.mxu0 %v4055_v46  ;;  %667 = vmatprep.subr.bf16.mxu1 %v4057_v48  ;;  %v4674_v45 = vld [vmem:[#allocation4 + $0x3a0] ss:$16 sps:$4 sm:$0xff]   ;;  %v4679_v46 = vld [vmem:[#allocation4 + $0x184] ss:$16 sps:$4 sm:$0xff]  }
  0x76   :  { %v4677_v48 = vld [vmem:[#allocation4 + $0x180] ss:$16 sps:$4 sm:$0xff]  }
  0x78   :  { %627 = vmatpush1.bf16.msra.mxu0 %v4054_v52  ;;  %668 = vmatpush1.bf16.msra.mxu1 %v4056_v53  ;;  %v4683_v52 = vld [vmem:[#allocation4 + $0x160] ss:$16 sps:$4 sm:$0xff]  }
  0x79   :  { %628 = vmatprep.subr.bf16.mxu0 %v4047_v54  ;;  %669 = vmatprep.subr.bf16.mxu1 %v4049_v56  ;;  %v4686_v53 = vld [vmem:[#allocation4 + $0x360] ss:$16 sps:$4 sm:$0xff]   ;;  %v4691_v54 = vld [vmem:[#allocation4 + $0x144] ss:$16 sps:$4 sm:$0xff]  }
  0x7a   :  { %v4689_v56 = vld [vmem:[#allocation4 + $0x140] ss:$16 sps:$4 sm:$0xff]  }
  0x7c   :  { %629 = vmatpush1.bf16.msra.mxu0 %v4046_v60  ;;  %670 = vmatpush1.bf16.msra.mxu1 %v4048_v61  ;;  %v4695_v60 = vld [vmem:[#allocation4 + $0x120] ss:$16 sps:$4 sm:$0xff]  }
  0x7d   :  { %630 = vmatprep.subr.bf16.mxu0 %v4039_v62  ;;  %671 = vmatprep.subr.bf16.mxu1 %v4041_v63  ;;  %v4698_v61 = vld [vmem:[#allocation4 + $0x320] ss:$16 sps:$4 sm:$0xff]   ;;  %v4703_v62 = vld [vmem:[#allocation4 + $0x104] ss:$16 sps:$4 sm:$0xff]  }
  0x7e   :  { %v4706_v63 = vld [vmem:[#allocation4 + $0x304] ss:$16 sps:$4 sm:$0xff]  }
  0x80   :  { %631 = vmatpush1.bf16.msra.mxu0 %v4038_v2  ;;  %672 = vmatpush1.bf16.msra.mxu1 %v4040_v4  ;;  %v4704_v2 = vld [vmem:[#allocation4 + $0x300] ss:$16 sps:$4 sm:$0xff]   ;;  %v4712_v4 = vld [vmem:[#allocation4 + $0x6e4] ss:$16 sps:$4 sm:$0xff]  }
  0x81   :  { %2272 = vmatprep.subr.bf16.mxu0 %v4613_v1  ;;  %2313 = vmatprep.subr.bf16.mxu1 %v4616_v3  ;;  %v4701_v1 = vld [vmem:[#allocation4 + $0x100] ss:$16 sps:$4 sm:$0xff]   ;;  %v4709_v3 = vld [vmem:[#allocation4 + $0x4e4] ss:$16 sps:$4 sm:$0xff]  }
  0x83   :  { %649 = vmatmul.mubr.bf16.vlgmr.msra.gmra.mxu0 %v5439_v12  ;;  %690 = vmatmul.mubr.bf16.vlgmr.msra.gmra.mxu1 %v5439_v12  ;;  %v4635_v12 = vld [vmem:[#allocation4 + $0x60] ss:$16 sps:$4 sm:$0xff]  }
  0x84   :  { %2273 = vmatpush1.bf16.msra.mxu0 %v4611_v5  ;;  %2314 = vmatpush1.bf16.msra.mxu1 %v4614_v6  ;;  %v174_v5 = vlaneseq }
  0x85   :  { %2274 = vmatprep.subr.bf16.mxu0 %v4619_v7  ;;  %2315 = vmatprep.subr.bf16.mxu1 %v4622_v8  ;;  %v5452_v7 = vld [vmem:[%s5571_s2] sm:$0xff] }
  0x86   :  { %v5447_v6 = vshrl.u32 %v174_v5, 7 }
  0x88   :  { %2275 = vmatpush1.bf16.msra.mxu0 %v4617_v9  ;;  %2316 = vmatpush1.bf16.msra.mxu1 %v4620_v10  ;;  %v5455_v8 = vsub.s32 0, %v5447_v6  ;;  %v5458_v9 = vsub.s32 2, %v5447_v6  ;;  %v5461_v10 = vsub.s32 1, %v5447_v6 }
  0x89   :  { %2276 = vmatprep.subr.bf16.mxu0 %v4625_v11  ;;  %2317 = vmatprep.subr.bf16.mxu1 %v4628_v13  ;;  %v5464_v11 = vsub.s32 3, %v5447_v6 }
  0x8a   :  { %v177_v13 = vrot.slane %v5452_v7, %v5455_v8 }
  0x8c   :  { %2277 = vmatpush1.bf16.msra.mxu0 %v4623_v14  ;;  %2318 = vmatpush1.bf16.msra.mxu1 %v4626_v15  ;;  %v185_v14 = vrot.slane %v5452_v7, %v5458_v9  ;;  %v181_v15 = vrot.slane %v5452_v7, %v5461_v10 }
  0x8d   :  { %2278 = vmatprep.subr.bf16.mxu0 %v4631_v16  ;;  %2319 = vmatprep.subr.bf16.mxu1 %v4634_v17  ;;  %v189_v17 = vrot.slane %v5452_v7, %v5464_v11 }
  0x90   :  { %2279 = vmatpush1.bf16.msra.mxu0 %v4629_v18  ;;  %2320 = vmatpush1.bf16.msra.mxu1 %v4632_v19 }
  0x91   :  { %2280 = vmatprep.subr.bf16.mxu0 %v4637_v20  ;;  %2321 = vmatprep.subr.bf16.mxu1 %v4640_v21 }
  0x94   :  { %2281 = vmatpush1.bf16.msra.mxu0 %v4635_v12  ;;  %2322 = vmatpush1.bf16.msra.mxu1 %v4638_v22 }
  0x95   :  { %2282 = vmatprep.subr.bf16.mxu0 %v4643_v23  ;;  %2323 = vmatprep.subr.bf16.mxu1 %v4646_v24 }
  0x98   :  { %2283 = vmatpush1.bf16.msra.mxu0 %v4641_v25  ;;  %2324 = vmatpush1.bf16.msra.mxu1 %v4644_v26 }
  0x99   :  { %2284 = vmatprep.subr.bf16.mxu0 %v4649_v27  ;;  %2325 = vmatprep.subr.bf16.mxu1 %v4652_v28 }
  0x9c   :  { %2285 = vmatpush1.bf16.msra.mxu0 %v4647_v29  ;;  %2326 = vmatpush1.bf16.msra.mxu1 %v4650_v30  ;;  %v4707_v29 = vld [vmem:[#allocation4 + $0x4e0] ss:$16 sps:$4 sm:$0xff]  }
  0x9d   :  { %2286 = vmatprep.subr.bf16.mxu0 %v4655_v31  ;;  %2327 = vmatprep.subr.bf16.mxu1 %v4658_v32  ;;  %v4710_v32 = vld [vmem:[#allocation4 + $0x6e0] ss:$16 sps:$4 sm:$0xff]  }
  0xa0   :  { %2287 = vmatpush1.bf16.msra.mxu0 %v4653_v33  ;;  %2328 = vmatpush1.bf16.msra.mxu1 %v4656_v34  ;;  %v4715_v33 = vld [vmem:[#allocation4 + $0x4c4] ss:$16 sps:$4 sm:$0xff]  }
  0xa1   :  { %2288 = vmatprep.subr.bf16.mxu0 %v4661_v35  ;;  %2329 = vmatprep.subr.bf16.mxu1 %v4664_v36 }
  0xa4   :  { %2289 = vmatpush2.bf16.msra.mxu0 %v4659_v37  ;;  %2330 = vmatpush2.bf16.msra.mxu1 %v4662_v38  ;;  %v4718_v37 = vld [vmem:[#allocation4 + $0x6c4] ss:$16 sps:$4 sm:$0xff]  }
  0xa5   :  { %2290 = vmatprep.subr.bf16.mxu0 %v4667_v39  ;;  %2331 = vmatprep.subr.bf16.mxu1 %v4670_v40  ;;  %v4713_v40 = vld [vmem:[#allocation4 + $0x4c0] ss:$16 sps:$4 sm:$0xff]  }
  0xa8   :  { %2291 = vmatpush2.bf16.msra.mxu0 %v4665_v0  ;;  %2332 = vmatpush2.bf16.msra.mxu1 %v4668_v41  ;;  %v4716_v0 = vld [vmem:[#allocation4 + $0x6c0] ss:$16 sps:$4 sm:$0xff]   ;;  %v4721_v41 = vld [vmem:[#allocation4 + $0x4a4] ss:$16 sps:$4 sm:$0xff]  }
  0xa9   :  { %2292 = vmatprep.subr.bf16.mxu0 %v4673_v42  ;;  %2333 = vmatprep.subr.bf16.mxu1 %v4676_v43  ;;  %v4724_v42 = vld [vmem:[#allocation4 + $0x6a4] ss:$16 sps:$4 sm:$0xff]   ;;  %v4719_v43 = vld [vmem:[#allocation4 + $0x4a0] ss:$16 sps:$4 sm:$0xff]  }
  0xac   :  { %2293 = vmatpush2.bf16.msra.mxu0 %v4671_v44  ;;  %2334 = vmatpush2.bf16.msra.mxu1 %v4674_v45  ;;  %v4722_v44 = vld [vmem:[#allocation4 + $0x6a0] ss:$16 sps:$4 sm:$0xff]   ;;  %v4727_v45 = vld [vmem:[#allocation4 + $0x484] ss:$16 sps:$4 sm:$0xff]  }
  0xad   :  { %2294 = vmatprep.subr.bf16.mxu0 %v4679_v46  ;;  %2335 = vmatprep.subr.bf16.mxu1 %v4682_v47  ;;  %v4730_v46 = vld [vmem:[#allocation4 + $0x684] ss:$16 sps:$4 sm:$0xff]   ;;  %v4725_v47 = vld [vmem:[#allocation4 + $0x480] ss:$16 sps:$4 sm:$0xff]  }
  0xb0   :  { %2295 = vmatpush2.bf16.msra.mxu0 %v4677_v48  ;;  %2336 = vmatpush2.bf16.msra.mxu1 %v4680_v49  ;;  %v4728_v48 = vld [vmem:[#allocation4 + $0x680] ss:$16 sps:$4 sm:$0xff]   ;;  %v4733_v49 = vld [vmem:[#allocation4 + $0x464] ss:$16 sps:$4 sm:$0xff]  }
  0xb1   :  { %2296 = vmatprep.subr.bf16.mxu0 %v4685_v50  ;;  %2337 = vmatprep.subr.bf16.mxu1 %v4688_v51  ;;  %v4736_v50 = vld [vmem:[#allocation4 + $0x664] ss:$16 sps:$4 sm:$0xff]   ;;  %v4731_v51 = vld [vmem:[#allocation4 + $0x460] ss:$16 sps:$4 sm:$0xff]  }
  0xb4   :  { %2297 = vmatpush2.bf16.msra.mxu0 %v4683_v52  ;;  %2338 = vmatpush2.bf16.msra.mxu1 %v4686_v53  ;;  %v4734_v52 = vld [vmem:[#allocation4 + $0x660] ss:$16 sps:$4 sm:$0xff]   ;;  %v4739_v53 = vld [vmem:[#allocation4 + $0x444] ss:$16 sps:$4 sm:$0xff]  }
  0xb5   :  { %2298 = vmatprep.subr.bf16.mxu0 %v4691_v54  ;;  %2339 = vmatprep.subr.bf16.mxu1 %v4694_v55  ;;  %v4742_v54 = vld [vmem:[#allocation4 + $0x644] ss:$16 sps:$4 sm:$0xff]   ;;  %v4737_v55 = vld [vmem:[#allocation4 + $0x440] ss:$16 sps:$4 sm:$0xff]  }
  0xb8   :  { %2299 = vmatpush2.bf16.msra.mxu0 %v4689_v56  ;;  %2340 = vmatpush2.bf16.msra.mxu1 %v4692_v57  ;;  %v196_v56 = vsub.s32 5, %v5447_v6  ;;  %v4740_v57 = vld [vmem:[#allocation4 + $0x640] ss:$16 sps:$4 sm:$0xff]  }
  0xb9   :  { %2300 = vmatprep.subr.bf16.mxu0 %v4697_v58  ;;  %2341 = vmatprep.subr.bf16.mxu1 %v4700_v59  ;;  %v4745_v58 = vld [vmem:[#allocation4 + $0x424] ss:$16 sps:$4 sm:$0xff]   ;;  %v204_v59 = vsub.s32 7, %v5447_v6 }
  0xbc   :  { %2301 = vmatpush2.bf16.msra.mxu0 %v4695_v60  ;;  %2342 = vmatpush2.bf16.msra.mxu1 %v4698_v61  ;;  %v4748_v60 = vld [vmem:[#allocation4 + $0x624] ss:$16 sps:$4 sm:$0xff]   ;;  %v4743_v61 = vld [vmem:[#allocation4 + $0x420] ss:$16 sps:$4 sm:$0xff]  }
  0xbd   :  { %2302 = vmatprep.subr.bf16.mxu0 %v4703_v62  ;;  %2343 = vmatprep.subr.bf16.mxu1 %v4706_v63  ;;  %v197_v62 = vrot.slane %v5452_v7, %v196_v56  ;;  %v4746_v63 = vld [vmem:[#allocation4 + $0x620] ss:$16 sps:$4 sm:$0xff]  }
  0xbe   :  { %v4788_v56 = vld [vmem:[#allocation4 + $0x740] ss:$16 sps:$4 sm:$0xff]  }
  0xc0   :  { %2303 = vmatpush2.bf16.msra.mxu0 %v4701_v1  ;;  %2344 = vmatpush2.bf16.msra.mxu1 %v4704_v2  ;;  %v4751_v1 = vld [vmem:[#allocation4 + $0x404] ss:$16 sps:$4 sm:$0xff]  }
  0xc1   :  { %2354 = vmatprep.subr.bf16.mxu0 %v4709_v3  ;;  %2395 = vmatprep.subr.bf16.mxu1 %v4712_v4  ;;  %v205_v3 = vrot.slane %v5452_v7, %v204_v59  ;;  %v4754_v4 = vld [vmem:[#allocation4 + $0x604] ss:$16 sps:$4 sm:$0xff]  }
 0x123   :  { %v568_v16 = vpop.f32.mrf.mxu0  ;;  %v609_v19 = vpop.f32.mrf.mxu1 }
 0x124   :  { %v569_v18 = vadd.f32 %v568_v16, %v177_v13  ;;  %v610_v20 = vadd.f32 %v609_v19, %v185_v14  ;;  %v4749_v14 = vld [vmem:[#allocation4 + $0x400] ss:$16 sps:$4 sm:$0xff]  }
 0x125   :  { %v570_v21 = vpop.f32.mrf.mxu0  ;;  %v611_v22 = vpop.f32.mrf.mxu1 }
 0x126   :  { %v571_v12 = vadd.f32 %v570_v21, %v181_v15  ;;  %v698_v23 = vmax.f32 %v569_v18, 0.0  ;;  %v700_v24 = vmax.f32 %v610_v20, 0.0  ;;  %v612_v25 = vadd.f32 %v611_v22, %v189_v17  ;;  %v4752_v17 = vld [vmem:[#allocation4 + $0x600] ss:$16 sps:$4 sm:$0xff]   ;;  %v4757_v18 = vld [vmem:[#allocation4 + $0x5e4] ss:$16 sps:$4 sm:$0xff]  }
 0x127   :  { %v572_v26 = vpop.f32.mrf.mxu0  ;;  %v613_v28 = vpop.f32.mrf.mxu1  ;;  %v4760_v21 = vld [vmem:[#allocation4 + $0x7e4] ss:$16 sps:$4 sm:$0xff]  }
 0x128   :  { %v699_v27 = vmax.f32 %v571_v12, 0.0  ;;  %v701_v30 = vmax.f32 %v612_v25, 0.0  ;;  %v5474_v34 = vpack.c.bf16 %v700_v24, %v700_v24  ;;  %v5478_v38 = vpack.c.bf16 %v698_v23, %v698_v23  ;;  %v4755_v25 = vld [vmem:[#allocation4 + $0x5e0] ss:$16 sps:$4 sm:$0xff]  }
 0x129   :  { %v573_v31 = vpop.f32.mrf.mxu0  ;;  %v614_v36 = vpop.f32.mrf.mxu1  ;;  %v4758_v28 = vld [vmem:[#allocation4 + $0x7e0] ss:$16 sps:$4 sm:$0xff]  }
 0x12a   :  { %v5476_v35 = vpack.c.bf16 %v699_v27, %v699_v27  ;;  %v5480_v39 = vpack.c.bf16 %v701_v30, %v701_v30  ;;  %v4766_v31 = vld [vmem:[#allocation4 + $0x7c4] ss:$16 sps:$4 sm:$0xff]  }
 0x12b   :  { %v4769_v36 = vld [vmem:[#allocation4 + $0x5a4] ss:$16 sps:$4 sm:$0xff]  }
 0x12c   :  { %2304 = vmatprep.mubr.bf16.mxu0 %v5476_v35  ;;  %2345 = vmatprep.mubr.bf16.mxu1 %v5480_v39 }
 0x12d   :  { %2305 = vmatmul.mubr.bf16.vlgmr.msra.gmra.mxu0 %v5478_v38  ;;  %2346 = vmatmul.mubr.bf16.vlgmr.msra.gmra.mxu1 %v5474_v34 }
 0x12e   :  { %2355 = vmatpush1.bf16.msra.mxu0 %v4707_v29  ;;  %2396 = vmatpush1.bf16.msra.mxu1 %v4710_v32  ;;  %v4763_v29 = vld [vmem:[#allocation4 + $0x5c4] ss:$16 sps:$4 sm:$0xff]   ;;  %v4761_v32 = vld [vmem:[#allocation4 + $0x5c0] ss:$16 sps:$4 sm:$0xff]  }
 0x12f   :  { %2356 = vmatprep.subr.bf16.mxu0 %v4715_v33  ;;  %2397 = vmatprep.subr.bf16.mxu1 %v4718_v37  ;;  %v4764_v33 = vld [vmem:[#allocation4 + $0x7c0] ss:$16 sps:$4 sm:$0xff]   ;;  %v4772_v37 = vld [vmem:[#allocation4 + $0x7a4] ss:$16 sps:$4 sm:$0xff]  }
 0x132   :  { %2357 = vmatpush1.bf16.msra.mxu0 %v4713_v40  ;;  %2398 = vmatpush1.bf16.msra.mxu1 %v4716_v0  ;;  %v4767_v40 = vld [vmem:[#allocation4 + $0x5a0] ss:$16 sps:$4 sm:$0xff]  }
 0x133   :  { %2358 = vmatprep.subr.bf16.mxu0 %v4721_v41  ;;  %2399 = vmatprep.subr.bf16.mxu1 %v4724_v42  ;;  %v4770_v0 = vld [vmem:[#allocation4 + $0x7a0] ss:$16 sps:$4 sm:$0xff]   ;;  %v4775_v41 = vld [vmem:[#allocation4 + $0x584] ss:$16 sps:$4 sm:$0xff]  }
 0x134   :  { %v4778_v42 = vld [vmem:[#allocation4 + $0x784] ss:$16 sps:$4 sm:$0xff]  }
 0x136   :  { %2359 = vmatpush1.bf16.msra.mxu0 %v4719_v43  ;;  %2400 = vmatpush1.bf16.msra.mxu1 %v4722_v44  ;;  %v4773_v43 = vld [vmem:[#allocation4 + $0x580] ss:$16 sps:$4 sm:$0xff]  }
 0x137   :  { %2360 = vmatprep.subr.bf16.mxu0 %v4727_v45  ;;  %2401 = vmatprep.subr.bf16.mxu1 %v4730_v46  ;;  %v4776_v44 = vld [vmem:[#allocation4 + $0x780] ss:$16 sps:$4 sm:$0xff]   ;;  %v4781_v45 = vld [vmem:[#allocation4 + $0x564] ss:$16 sps:$4 sm:$0xff]  }
 0x138   :  { %v4784_v46 = vld [vmem:[#allocation4 + $0x764] ss:$16 sps:$4 sm:$0xff]  }
 0x13a   :  { %2361 = vmatpush1.bf16.msra.mxu0 %v4725_v47  ;;  %2402 = vmatpush1.bf16.msra.mxu1 %v4728_v48  ;;  %v4779_v47 = vld [vmem:[#allocation4 + $0x560] ss:$16 sps:$4 sm:$0xff]   ;;  %v200_v48 = vsub.s32 6, %v5447_v6 }
 0x13b   :  { %2362 = vmatprep.subr.bf16.mxu0 %v4733_v49  ;;  %2403 = vmatprep.subr.bf16.mxu1 %v4736_v50  ;;  %v4782_v49 = vld [vmem:[#allocation4 + $0x760] ss:$16 sps:$4 sm:$0xff]   ;;  %v192_v50 = vsub.s32 4, %v5447_v6 }
 0x13e   :  { %2363 = vmatpush1.bf16.msra.mxu0 %v4731_v51  ;;  %2404 = vmatpush1.bf16.msra.mxu1 %v4734_v52  ;;  %v4787_v51 = vld [vmem:[#allocation4 + $0x544] ss:$16 sps:$4 sm:$0xff]  }
 0x13f   :  { %2364 = vmatprep.subr.bf16.mxu0 %v4739_v53  ;;  %2405 = vmatprep.subr.bf16.mxu1 %v4742_v54  ;;  %v4790_v52 = vld [vmem:[#allocation4 + $0x744] ss:$16 sps:$4 sm:$0xff]   ;;  %v201_v53 = vrot.slane %v5452_v7, %v200_v48  ;;  %v4785_v54 = vld [vmem:[#allocation4 + $0x540] ss:$16 sps:$4 sm:$0xff]   ;;  %v4856_v48 = vld [vmem:[#allocation4 + $0x3ec] ss:$16 sps:$4 sm:$0xff]  }
 0x142   :  { %2365 = vmatpush1.bf16.msra.mxu0 %v4737_v55  ;;  %2406 = vmatpush1.bf16.msra.mxu1 %v4740_v57  ;;  %v193_v55 = vrot.slane %v5452_v7, %v192_v50  ;;  %v4793_v57 = vld [vmem:[#allocation4 + $0x524] ss:$16 sps:$4 sm:$0xff]   ;;  %v4797_v7 = vld [vmem:[#allocation4 + $0x500] ss:$16 sps:$4 sm:$0xff]   ;;  %v4854_v50 = vld [vmem:[#allocation4 + $0x3e8] ss:$16 sps:$4 sm:$0xff]  }
 0x143   :  { %2366 = vmatprep.subr.bf16.mxu0 %v4745_v58  ;;  %v5489_v2 = vpop.f32.mrf.mxu0  ;;  %2407 = vmatprep.subr.bf16.mxu1 %v4748_v60  ;;  %v5492_v5 = vpop.f32.mrf.mxu1  ;;  %v4796_v58 = vld [vmem:[#allocation4 + $0x724] ss:$16 sps:$4 sm:$0xff]   ;;  %v4791_v60 = vld [vmem:[#allocation4 + $0x520] ss:$16 sps:$4 sm:$0xff]  }
 0x144   :  { %v692_v59 = vadd.f32 %v5492_v5, %v201_v53  ;;  %v651_v6 = vadd.f32 %v5489_v2, %v193_v55  ;;  %v4808_v5 = vld [vmem:[#allocation4 + $0x2ec] ss:$16 sps:$4 sm:$0xff]   ;;  %v4803_v2 = vld [vmem:[#allocation4 + $0xe8] ss:$16 sps:$4 sm:$0xff]  }
 0x145   :  { %v652_v13 = vpop.f32.mrf.mxu0  ;;  %v693_v16 = vpop.f32.mrf.mxu1  ;;  %v4857_v53 = vld [vmem:[#allocation4 + $0x1c8] ss:$16 sps:$4 sm:$0xff]   ;;  %v4865_v55 = vld [vmem:[#allocation4 + $0x1ac] ss:$16 sps:$4 sm:$0xff]  }
 0x146   :  { %2367 = vmatpush1.bf16.msra.mxu0 %v4743_v61  ;;  %v653_v15 = vadd.f32 %v652_v13, %v197_v62  ;;  %2408 = vmatpush1.bf16.msra.mxu1 %v4746_v63  ;;  %v694_v20 = vadd.f32 %v693_v16, %v205_v3  ;;  %v4794_v61 = vld [vmem:[#allocation4 + $0x720] ss:$16 sps:$4 sm:$0xff]   ;;  %v4799_v62 = vld [vmem:[#allocation4 + $0x504] ss:$16 sps:$4 sm:$0xff]   ;;  %v702_v3 = vmax.f32 %v651_v6, 0.0 }
 0x147   :  { %2368 = vmatprep.subr.bf16.mxu0 %v4751_v1  ;;  %v654_v19 = vpop.f32.mrf.mxu0  ;;  %2409 = vmatprep.subr.bf16.mxu1 %v4754_v4  ;;  %v695_v22 = vpop.f32.mrf.mxu1  ;;  %v4802_v63 = vld [vmem:[#allocation4 + $0x704] ss:$16 sps:$4 sm:$0xff]   ;;  %v704_v1 = vmax.f32 %v692_v59, 0.0  ;;  %v4800_v4 = vld [vmem:[#allocation4 + $0x700] ss:$16 sps:$4 sm:$0xff]  }
 0x148   :  { %v703_v12 = vmax.f32 %v653_v15, 0.0  ;;  %v705_v23 = vmax.f32 %v694_v20, 0.0  ;;  %v4805_v13 = vld [vmem:[#allocation4 + $0xec] ss:$16 sps:$4 sm:$0xff]   ;;  %v5508_v15 = vpack.c.bf16 %v702_v3, %v702_v3  ;;  %v4806_v16 = vld [vmem:[#allocation4 + $0x2e8] ss:$16 sps:$4 sm:$0xff]  }
 0x149   :  { %v655_v24 = vpop.f32.mrf.mxu0  ;;  %v696_v27 = vpop.f32.mrf.mxu1  ;;  %v4809_v19 = vld [vmem:[#allocation4 + $0xc8] ss:$16 sps:$4 sm:$0xff]   ;;  %v4871_v59 = vld [vmem:[#allocation4 + $0x18c] ss:$16 sps:$4 sm:$0xff]  }
 0x14a   :  { %2369 = vmatpush1.bf16.msra.mxu0 %v4749_v14  ;;  %v5494_v26 = vpack.c.bf16 %v703_v12, %v703_v12  ;;  %2410 = vmatpush1.bf16.msra.mxu1 %v4752_v17  ;;  %v5496_v30 = vpack.c.bf16 %v705_v23, %v705_v23  ;;  %v5506_v14 = vpack.c.bf16 %v704_v1, %v704_v1  ;;  %v4811_v17 = vld [vmem:[#allocation4 + $0xcc] ss:$16 sps:$4 sm:$0xff]   ;;  %v4812_v20 = vld [vmem:[#allocation4 + $0x2c8] ss:$16 sps:$4 sm:$0xff]  }
 0x14b   :  { %2370 = vmatprep.subr.bf16.mxu0 %v4757_v18  ;;  %2411 = vmatprep.subr.bf16.mxu1 %v4760_v21  ;;  %v4814_v18 = vld [vmem:[#allocation4 + $0x2cc] ss:$16 sps:$4 sm:$0xff]   ;;  %v4815_v22 = vld [vmem:[#allocation4 + $0xa8] ss:$16 sps:$4 sm:$0xff]  }
 0x14c   :  { %2386 = vmatprep.mubr.bf16.mxu0 %v5494_v26  ;;  %2427 = vmatprep.mubr.bf16.mxu1 %v5496_v30  ;;  %v4817_v21 = vld [vmem:[#allocation4 + $0xac] ss:$16 sps:$4 sm:$0xff]   ;;  %v4818_v23 = vld [vmem:[#allocation4 + $0x2a8] ss:$16 sps:$4 sm:$0xff]  }
 0x14d   :  { %v4820_v12 = vld [vmem:[#allocation4 + $0x2ac] ss:$16 sps:$4 sm:$0xff]   ;;  %v4821_v27 = vld [vmem:[#allocation4 + $0x88] ss:$16 sps:$4 sm:$0xff]  }
 0x14e   :  { %2371 = vmatpush2.bf16.msra.mxu0 %v4755_v25  ;;  %2412 = vmatpush2.bf16.msra.mxu1 %v4758_v28  ;;  %v4823_v24 = vld [vmem:[#allocation4 + $0x8c] ss:$16 sps:$4 sm:$0xff]   ;;  %v4869_v6 = vld [vmem:[#allocation4 + $0x188] ss:$16 sps:$4 sm:$0xff]  }
 0x14f   :  { %2372 = vmatprep.subr.bf16.mxu0 %v4763_v29  ;;  %2413 = vmatprep.subr.bf16.mxu1 %v4766_v31  ;;  %v4826_v25 = vld [vmem:[#allocation4 + $0x28c] ss:$16 sps:$4 sm:$0xff]   ;;  %v4830_v31 = vld [vmem:[#allocation4 + $0x268] ss:$16 sps:$4 sm:$0xff]  }
 0x150   :  { %v4829_v28 = vld [vmem:[#allocation4 + $0x6c] ss:$16 sps:$4 sm:$0xff]   ;;  %v4875_v1 = vld [vmem:[#allocation4 + $0x168] ss:$16 sps:$4 sm:$0xff]  }
 0x151   :  { %v4832_v29 = vld [vmem:[#allocation4 + $0x26c] ss:$16 sps:$4 sm:$0xff]  }
 0x152   :  { %2373 = vmatpush2.bf16.msra.mxu0 %v4761_v32  ;;  %2414 = vmatpush2.bf16.msra.mxu1 %v4764_v33  ;;  %v4835_v32 = vld [vmem:[#allocation4 + $0x4c] ss:$16 sps:$4 sm:$0xff]  }
 0x153   :  { %2374 = vmatprep.subr.bf16.mxu0 %v4769_v36  ;;  %2415 = vmatprep.subr.bf16.mxu1 %v4772_v37  ;;  %v4838_v33 = vld [vmem:[#allocation4 + $0x24c] ss:$16 sps:$4 sm:$0xff]   ;;  %v4833_v36 = vld [vmem:[#allocation4 + $0x48] ss:$16 sps:$4 sm:$0xff]  }
 0x154   :  { %v4836_v37 = vld [vmem:[#allocation4 + $0x248] ss:$16 sps:$4 sm:$0xff]   ;;  %v4883_v3 = vld [vmem:[#allocation4 + $0x14c] ss:$16 sps:$4 sm:$0xff]  }
 0x156   :  { %2375 = vmatpush2.bf16.msra.mxu0 %v4767_v40  ;;  %2416 = vmatpush2.bf16.msra.mxu1 %v4770_v0  ;;  %v4841_v40 = vld [vmem:[#allocation4 + $0x2c] ss:$16 sps:$4 sm:$0xff]  }
 0x157   :  { %2376 = vmatprep.subr.bf16.mxu0 %v4775_v41  ;;  %2417 = vmatprep.subr.bf16.mxu1 %v4778_v42  ;;  %v4844_v0 = vld [vmem:[#allocation4 + $0x22c] ss:$16 sps:$4 sm:$0xff]   ;;  %v4839_v41 = vld [vmem:[#allocation4 + $0x28] ss:$16 sps:$4 sm:$0xff]  }
 0x158   :  { %v4842_v42 = vld [vmem:[#allocation4 + $0x228] ss:$16 sps:$4 sm:$0xff]  }
 0x15a   :  { %2377 = vmatpush2.bf16.msra.mxu0 %v4773_v43  ;;  %2418 = vmatpush2.bf16.msra.mxu1 %v4776_v44  ;;  %v4847_v43 = vld [vmem:[#allocation4 + $0xc] ss:$16 sps:$4 sm:$0xff]  }
 0x15b   :  { %2378 = vmatprep.subr.bf16.mxu0 %v4781_v45  ;;  %2419 = vmatprep.subr.bf16.mxu1 %v4784_v46  ;;  %v4850_v44 = vld [vmem:[#allocation4 + $0x20c] ss:$16 sps:$4 sm:$0xff]   ;;  %v4845_v45 = vld [vmem:[#allocation4 + $0x8] ss:$16 sps:$4 sm:$0xff]  }
 0x15c   :  { %v4848_v46 = vld [vmem:[#allocation4 + $0x208] ss:$16 sps:$4 sm:$0xff]  }
 0x15e   :  { %2379 = vmatpush2.bf16.msra.mxu0 %v4779_v47  ;;  %2420 = vmatpush2.bf16.msra.mxu1 %v4782_v49  ;;  %v4853_v47 = vld [vmem:[#allocation4 + $0x1ec] ss:$16 sps:$4 sm:$0xff]   ;;  %v4851_v49 = vld [vmem:[#allocation4 + $0x1e8] ss:$16 sps:$4 sm:$0xff]  }
 0x15f   :  { %2380 = vmatprep.subr.bf16.mxu0 %v4787_v51  ;;  %2421 = vmatprep.subr.bf16.mxu1 %v4790_v52  ;;  %v4859_v51 = vld [vmem:[#allocation4 + $0x1cc] ss:$16 sps:$4 sm:$0xff]  }
 0x160   :  { %v4862_v52 = vld [vmem:[#allocation4 + $0x3cc] ss:$16 sps:$4 sm:$0xff]  }
 0x162   :  { %2381 = vmatpush2.bf16.msra.mxu0 %v4785_v54  ;;  %2422 = vmatpush2.bf16.msra.mxu1 %v4788_v56  ;;  %v4860_v54 = vld [vmem:[#allocation4 + $0x3c8] ss:$16 sps:$4 sm:$0xff]   ;;  %v4868_v56 = vld [vmem:[#allocation4 + $0x3ac] ss:$16 sps:$4 sm:$0xff]  }
 0x163   :  { %2382 = vmatprep.subr.bf16.mxu0 %v4793_v57  ;;  %2423 = vmatprep.subr.bf16.mxu1 %v4796_v58  ;;  %v4863_v57 = vld [vmem:[#allocation4 + $0x1a8] ss:$16 sps:$4 sm:$0xff]  }
 0x164   :  { %v4866_v58 = vld [vmem:[#allocation4 + $0x3a8] ss:$16 sps:$4 sm:$0xff]  }
 0x166   :  { %2383 = vmatpush2.bf16.msra.mxu0 %v4791_v60  ;;  %2424 = vmatpush2.bf16.msra.mxu1 %v4794_v61  ;;  %v4874_v60 = vld [vmem:[#allocation4 + $0x38c] ss:$16 sps:$4 sm:$0xff]   ;;  %v4872_v61 = vld [vmem:[#allocation4 + $0x388] ss:$16 sps:$4 sm:$0xff]  }
 0x167   :  { %2384 = vmatprep.subr.bf16.mxu0 %v4799_v62  ;;  %2425 = vmatprep.subr.bf16.mxu1 %v4802_v63  ;;  %v4877_v62 = vld [vmem:[#allocation4 + $0x16c] ss:$16 sps:$4 sm:$0xff]  }
 0x168   :  { %v4880_v63 = vld [vmem:[#allocation4 + $0x36c] ss:$16 sps:$4 sm:$0xff]  }
 0x16a   :  { %2385 = vmatpush2.bf16.msra.mxu0 %v4797_v7  ;;  %2426 = vmatpush2.bf16.msra.mxu1 %v4800_v4  ;;  %v4878_v7 = vld [vmem:[#allocation4 + $0x368] ss:$16 sps:$4 sm:$0xff]   ;;  %v4886_v4 = vld [vmem:[#allocation4 + $0x34c] ss:$16 sps:$4 sm:$0xff]  }
 0x16b   :  { %2436 = vmatprep.subr.bf16.mxu0 %v4805_v13  ;;  %2477 = vmatprep.subr.bf16.mxu1 %v4808_v5  ;;  %v4881_v13 = vld [vmem:[#allocation4 + $0x148] ss:$16 sps:$4 sm:$0xff]  }
 0x16c   :  { %v4884_v5 = vld [vmem:[#allocation4 + $0x348] ss:$16 sps:$4 sm:$0xff]  }
 0x16d   :  { %2387 = vmatmul.mubr.bf16.vlgmr.msra.gmra.mxu0 %v5508_v15  ;;  %2428 = vmatmul.mubr.bf16.vlgmr.msra.gmra.mxu1 %v5506_v14 }
 0x16e   :  { %2437 = vmatpush1.bf16.msra.mxu0 %v4803_v2  ;;  %2468 = vmatprep.mubr.bf16.mxu0 %v5476_v35  ;;  %v4824_v35 = vld [vmem:[#allocation4 + $0x288] ss:$16 sps:$4 sm:$0xff]   ;;  %v4889_v2 = vld [vmem:[#allocation4 + $0x12c] ss:$16 sps:$4 sm:$0xff]  }
 0x16f   :  { %2478 = vmatpush1.bf16.msra.mxu1 %v4806_v16  ;;  %2509 = vmatprep.mubr.bf16.mxu1 %v5480_v39  ;;  %v4827_v39 = vld [vmem:[#allocation4 + $0x68] ss:$16 sps:$4 sm:$0xff]   ;;  %v4892_v16 = vld [vmem:[#allocation4 + $0x32c] ss:$16 sps:$4 sm:$0xff]  }
 0x170   :  { %2438 = vmatprep.subr.bf16.mxu0 %v4811_v17  ;;  %2479 = vmatprep.subr.bf16.mxu1 %v4814_v18  ;;  %v4887_v17 = vld [vmem:[#allocation4 + $0x128] ss:$16 sps:$4 sm:$0xff]  }
 0x171   :  { %v4890_v18 = vld [vmem:[#allocation4 + $0x328] ss:$16 sps:$4 sm:$0xff]  }
 0x172   :  { %2439 = vmatpush1.bf16.msra.mxu0 %v4809_v19  ;;  %v4895_v19 = vld [vmem:[#allocation4 + $0x10c] ss:$16 sps:$4 sm:$0xff]  }
 0x173   :  { %2480 = vmatpush1.bf16.msra.mxu1 %v4812_v20  ;;  %2440 = vmatprep.subr.bf16.mxu0 %v4817_v21  ;;  %v4898_v20 = vld [vmem:[#allocation4 + $0x30c] ss:$16 sps:$4 sm:$0xff]   ;;  %v4893_v21 = vld [vmem:[#allocation4 + $0x108] ss:$16 sps:$4 sm:$0xff]  }
 0x174   :  { %2481 = vmatprep.subr.bf16.mxu1 %v4820_v12  ;;  %v4896_v12 = vld [vmem:[#allocation4 + $0x308] ss:$16 sps:$4 sm:$0xff]  }
 0x176   :  { %2441 = vmatpush1.bf16.msra.mxu0 %v4815_v22  ;;  %v4901_v22 = vld [vmem:[#allocation4 + $0x4ec] ss:$16 sps:$4 sm:$0xff]  }
 0x177   :  { %2482 = vmatpush1.bf16.msra.mxu1 %v4818_v23  ;;  %2442 = vmatprep.subr.bf16.mxu0 %v4823_v24  ;;  %v4904_v23 = vld [vmem:[#allocation4 + $0x6ec] ss:$16 sps:$4 sm:$0xff]   ;;  %v4899_v24 = vld [vmem:[#allocation4 + $0x4e8] ss:$16 sps:$4 sm:$0xff]  }
 0x178   :  { %2483 = vmatprep.subr.bf16.mxu1 %v4826_v25  ;;  %v4902_v25 = vld [vmem:[#allocation4 + $0x6e8] ss:$16 sps:$4 sm:$0xff]  }
 0x17a   :  { %2443 = vmatpush1.bf16.msra.mxu0 %v4821_v27  ;;  %v4907_v27 = vld [vmem:[#allocation4 + $0x4cc] ss:$16 sps:$4 sm:$0xff]  }
 0x17b   :  { %2484 = vmatpush1.bf16.msra.mxu1 %v4824_v35  ;;  %2444 = vmatprep.subr.bf16.mxu0 %v4829_v28  ;;  %v4910_v35 = vld [vmem:[#allocation4 + $0x6cc] ss:$16 sps:$4 sm:$0xff]   ;;  %v4905_v28 = vld [vmem:[#allocation4 + $0x4c8] ss:$16 sps:$4 sm:$0xff]  }
 0x17c   :  { %2485 = vmatprep.subr.bf16.mxu1 %v4832_v29  ;;  %v4908_v29 = vld [vmem:[#allocation4 + $0x6c8] ss:$16 sps:$4 sm:$0xff]  }
 0x17e   :  { %2445 = vmatpush1.bf16.msra.mxu0 %v4827_v39  ;;  %v4913_v39 = vld [vmem:[#allocation4 + $0x4ac] ss:$16 sps:$4 sm:$0xff]  }
 0x17f   :  { %2486 = vmatpush1.bf16.msra.mxu1 %v4830_v31  ;;  %2446 = vmatprep.subr.bf16.mxu0 %v4835_v32  ;;  %v4916_v31 = vld [vmem:[#allocation4 + $0x6ac] ss:$16 sps:$4 sm:$0xff]   ;;  %v4911_v32 = vld [vmem:[#allocation4 + $0x4a8] ss:$16 sps:$4 sm:$0xff]  }
 0x180   :  { %2487 = vmatprep.subr.bf16.mxu1 %v4838_v33  ;;  %v4919_v33 = vld [vmem:[#allocation4 + $0x48c] ss:$16 sps:$4 sm:$0xff]  }
 0x182   :  { %2447 = vmatpush1.bf16.msra.mxu0 %v4833_v36  ;;  %v4917_v36 = vld [vmem:[#allocation4 + $0x488] ss:$16 sps:$4 sm:$0xff]  }
 0x183   :  { %2488 = vmatpush1.bf16.msra.mxu1 %v4836_v37  ;;  %2448 = vmatprep.subr.bf16.mxu0 %v4841_v40  ;;  %v4925_v37 = vld [vmem:[#allocation4 + $0x46c] ss:$16 sps:$4 sm:$0xff]  }
 0x184   :  { %2489 = vmatprep.subr.bf16.mxu1 %v4844_v0  ;;  %v4928_v40 = vld [vmem:[#allocation4 + $0x66c] ss:$16 sps:$4 sm:$0xff]   ;;  %v4926_v0 = vld [vmem:[#allocation4 + $0x668] ss:$16 sps:$4 sm:$0xff]  }
 0x186   :  { %2449 = vmatpush1.bf16.msra.mxu0 %v4839_v41  ;;  %v4931_v41 = vld [vmem:[#allocation4 + $0x44c] ss:$16 sps:$4 sm:$0xff]  }
 0x187   :  { %2490 = vmatpush1.bf16.msra.mxu1 %v4842_v42  ;;  %2450 = vmatprep.subr.bf16.mxu0 %v4847_v43  ;;  %v4934_v42 = vld [vmem:[#allocation4 + $0x64c] ss:$16 sps:$4 sm:$0xff]   ;;  %v4929_v43 = vld [vmem:[#allocation4 + $0x448] ss:$16 sps:$4 sm:$0xff]  }
 0x188   :  { %2491 = vmatprep.subr.bf16.mxu1 %v4850_v44  ;;  %v4932_v44 = vld [vmem:[#allocation4 + $0x648] ss:$16 sps:$4 sm:$0xff]  }
 0x18a   :  { %2451 = vmatpush1.bf16.msra.mxu0 %v4845_v45  ;;  %v4937_v45 = vld [vmem:[#allocation4 + $0x42c] ss:$16 sps:$4 sm:$0xff]  }
 0x18b   :  { %2492 = vmatpush1.bf16.msra.mxu1 %v4848_v46  ;;  %2452 = vmatprep.subr.bf16.mxu0 %v4853_v47  ;;  %v4940_v46 = vld [vmem:[#allocation4 + $0x62c] ss:$16 sps:$4 sm:$0xff]   ;;  %v4935_v47 = vld [vmem:[#allocation4 + $0x428] ss:$16 sps:$4 sm:$0xff]  }
 0x18c   :  { %2493 = vmatprep.subr.bf16.mxu1 %v4856_v48  ;;  %v4938_v48 = vld [vmem:[#allocation4 + $0x628] ss:$16 sps:$4 sm:$0xff]  }
 0x18e   :  { %2453 = vmatpush2.bf16.msra.mxu0 %v4851_v49  ;;  %v4943_v49 = vld [vmem:[#allocation4 + $0x40c] ss:$16 sps:$4 sm:$0xff]  }
 0x18f   :  { %2494 = vmatpush2.bf16.msra.mxu1 %v4854_v50  ;;  %2454 = vmatprep.subr.bf16.mxu0 %v4859_v51  ;;  %v4946_v50 = vld [vmem:[#allocation4 + $0x60c] ss:$16 sps:$4 sm:$0xff]   ;;  %v4941_v51 = vld [vmem:[#allocation4 + $0x408] ss:$16 sps:$4 sm:$0xff]  }
 0x190   :  { %2495 = vmatprep.subr.bf16.mxu1 %v4862_v52  ;;  %v4944_v52 = vld [vmem:[#allocation4 + $0x608] ss:$16 sps:$4 sm:$0xff]  }
 0x192   :  { %2455 = vmatpush2.bf16.msra.mxu0 %v4857_v53  ;;  %v4949_v53 = vld [vmem:[#allocation4 + $0x5ec] ss:$16 sps:$4 sm:$0xff]  }
 0x193   :  { %2496 = vmatpush2.bf16.msra.mxu1 %v4860_v54  ;;  %2456 = vmatprep.subr.bf16.mxu0 %v4865_v55  ;;  %v4952_v54 = vld [vmem:[#allocation4 + $0x7ec] ss:$16 sps:$4 sm:$0xff]   ;;  %v4947_v55 = vld [vmem:[#allocation4 + $0x5e8] ss:$16 sps:$4 sm:$0xff]  }
 0x194   :  { %2497 = vmatprep.subr.bf16.mxu1 %v4868_v56  ;;  %v4950_v56 = vld [vmem:[#allocation4 + $0x7e8] ss:$16 sps:$4 sm:$0xff]  }
 0x196   :  { %2457 = vmatpush2.bf16.msra.mxu0 %v4863_v57  ;;  %v4955_v57 = vld [vmem:[#allocation4 + $0x5cc] ss:$16 sps:$4 sm:$0xff]  }
 0x197   :  { %2498 = vmatpush2.bf16.msra.mxu1 %v4866_v58  ;;  %2458 = vmatprep.subr.bf16.mxu0 %v4871_v59  ;;  %v4958_v58 = vld [vmem:[#allocation4 + $0x7cc] ss:$16 sps:$4 sm:$0xff]   ;;  %v4953_v59 = vld [vmem:[#allocation4 + $0x5c8] ss:$16 sps:$4 sm:$0xff]  }
 0x198   :  { %2499 = vmatprep.subr.bf16.mxu1 %v4874_v60  ;;  %v4956_v60 = vld [vmem:[#allocation4 + $0x7c8] ss:$16 sps:$4 sm:$0xff]  }
 0x19a   :  { %2459 = vmatpush2.bf16.msra.mxu0 %v4869_v6  ;;  %v4961_v6 = vld [vmem:[#allocation4 + $0x5ac] ss:$16 sps:$4 sm:$0xff]  }
 0x19b   :  { %2500 = vmatpush2.bf16.msra.mxu1 %v4872_v61  ;;  %2460 = vmatprep.subr.bf16.mxu0 %v4877_v62  ;;  %v4964_v61 = vld [vmem:[#allocation4 + $0x7ac] ss:$16 sps:$4 sm:$0xff]   ;;  %v4959_v62 = vld [vmem:[#allocation4 + $0x5a8] ss:$16 sps:$4 sm:$0xff]  }
 0x19c   :  { %2501 = vmatprep.subr.bf16.mxu1 %v4880_v63  ;;  %v4962_v63 = vld [vmem:[#allocation4 + $0x7a8] ss:$16 sps:$4 sm:$0xff]  }
 0x19e   :  { %2461 = vmatpush2.bf16.msra.mxu0 %v4875_v1  ;;  %v4967_v1 = vld [vmem:[#allocation4 + $0x58c] ss:$16 sps:$4 sm:$0xff]  }
 0x19f   :  { %2502 = vmatpush2.bf16.msra.mxu1 %v4878_v7  ;;  %2462 = vmatprep.subr.bf16.mxu0 %v4883_v3  ;;  %v4970_v7 = vld [vmem:[#allocation4 + $0x78c] ss:$16 sps:$4 sm:$0xff]   ;;  %v4965_v3 = vld [vmem:[#allocation4 + $0x588] ss:$16 sps:$4 sm:$0xff]  }
 0x1a0   :  { %2503 = vmatprep.subr.bf16.mxu1 %v4886_v4  ;;  %v4968_v4 = vld [vmem:[#allocation4 + $0x788] ss:$16 sps:$4 sm:$0xff]  }
 0x1a2   :  { %2463 = vmatpush2.bf16.msra.mxu0 %v4881_v13  ;;  %v4973_v13 = vld [vmem:[#allocation4 + $0x56c] ss:$16 sps:$4 sm:$0xff]  }
 0x1a3   :  { %2504 = vmatpush2.bf16.msra.mxu1 %v4884_v5  ;;  %2464 = vmatprep.subr.bf16.mxu0 %v4889_v2  ;;  %v4976_v5 = vld [vmem:[#allocation4 + $0x76c] ss:$16 sps:$4 sm:$0xff]   ;;  %v4971_v2 = vld [vmem:[#allocation4 + $0x568] ss:$16 sps:$4 sm:$0xff]  }
 0x1a4   :  { %2505 = vmatprep.subr.bf16.mxu1 %v4892_v16  ;;  %v4974_v16 = vld [vmem:[#allocation4 + $0x768] ss:$16 sps:$4 sm:$0xff]  }
 0x1a6   :  { %2465 = vmatpush2.bf16.msra.mxu0 %v4887_v17  ;;  %v4979_v17 = vld [vmem:[#allocation4 + $0x54c] ss:$16 sps:$4 sm:$0xff]  }
 0x1a7   :  { %2506 = vmatpush2.bf16.msra.mxu1 %v4890_v18  ;;  %2466 = vmatprep.subr.bf16.mxu0 %v4895_v19  ;;  %v4982_v18 = vld [vmem:[#allocation4 + $0x74c] ss:$16 sps:$4 sm:$0xff]   ;;  %v4977_v19 = vld [vmem:[#allocation4 + $0x548] ss:$16 sps:$4 sm:$0xff]  }
 0x1a8   :  { %2507 = vmatprep.subr.bf16.mxu1 %v4898_v20  ;;  %v4980_v20 = vld [vmem:[#allocation4 + $0x748] ss:$16 sps:$4 sm:$0xff]  }
 0x1aa   :  { %2467 = vmatpush2.bf16.msra.mxu0 %v4893_v21  ;;  %v4985_v21 = vld [vmem:[#allocation4 + $0x52c] ss:$16 sps:$4 sm:$0xff]  }
 0x1ab   :  { %2508 = vmatpush2.bf16.msra.mxu1 %v4896_v12  ;;  %2518 = vmatprep.subr.bf16.mxu0 %v4901_v22  ;;  %v4988_v12 = vld [vmem:[#allocation4 + $0x72c] ss:$16 sps:$4 sm:$0xff]   ;;  %v4983_v22 = vld [vmem:[#allocation4 + $0x528] ss:$16 sps:$4 sm:$0xff]  }
 0x1ac   :  { %2559 = vmatprep.subr.bf16.mxu1 %v4904_v23  ;;  %v4986_v23 = vld [vmem:[#allocation4 + $0x728] ss:$16 sps:$4 sm:$0xff]  }
 0x1ad   :  { %2469 = vmatmul.mubr.bf16.vlgmr.msra.gmra.mxu0 %v5478_v38  ;;  %v4914_v38 = vld [vmem:[#allocation4 + $0x6a8] ss:$16 sps:$4 sm:$0xff]  }
 0x1ae   :  { %2510 = vmatmul.mubr.bf16.vlgmr.msra.gmra.mxu1 %v5474_v34  ;;  %2519 = vmatpush1.bf16.msra.mxu0 %v4899_v24  ;;  %v4922_v34 = vld [vmem:[#allocation4 + $0x68c] ss:$16 sps:$4 sm:$0xff]  }
 0x1af   :  { %2550 = vmatprep.mubr.bf16.mxu0 %v5494_v26  ;;  %2560 = vmatpush1.bf16.msra.mxu1 %v4902_v25  ;;  %v4920_v26 = vld [vmem:[#allocation4 + $0x688] ss:$16 sps:$4 sm:$0xff]   ;;  %v4991_v24 = vld [vmem:[#allocation4 + $0x50c] ss:$16 sps:$4 sm:$0xff]  }
 0x1b0   :  { %2591 = vmatprep.mubr.bf16.mxu1 %v5496_v30  ;;  %2520 = vmatprep.subr.bf16.mxu0 %v4907_v27  ;;  %v4923_v30 = vld [vmem:[#allocation4 + $0x468] ss:$16 sps:$4 sm:$0xff]   ;;  %v4994_v25 = vld [vmem:[#allocation4 + $0x70c] ss:$16 sps:$4 sm:$0xff]  }
 0x1b1   :  { %2561 = vmatprep.subr.bf16.mxu1 %v4910_v35  ;;  %v4989_v27 = vld [vmem:[#allocation4 + $0x508] ss:$16 sps:$4 sm:$0xff]  }
 0x1b2   :  { %2521 = vmatpush1.bf16.msra.mxu0 %v4905_v28  ;;  %v4992_v35 = vld [vmem:[#allocation4 + $0x708] ss:$16 sps:$4 sm:$0xff]   ;;  %v4997_v28 = vld [vmem:[#allocation6 + $0xe4] ss:$16 sps:$4 sm:$0xff]  }
 0x1b3   :  { %2562 = vmatpush1.bf16.msra.mxu1 %v4908_v29  ;;  %2522 = vmatprep.subr.bf16.mxu0 %v4913_v39  ;;  %v4995_v29 = vld [vmem:[#allocation6 + $0xe0] ss:$16 sps:$4 sm:$0xff]   ;;  %v5000_v39 = vld [vmem:[#allocation6 + $0xc4] ss:$16 sps:$4 sm:$0xff]  }
 0x1b4   :  { %2563 = vmatprep.subr.bf16.mxu1 %v4916_v31 }
 0x1b6   :  { %2523 = vmatpush1.bf16.msra.mxu0 %v4911_v32 }
 0x1b7   :  { %2564 = vmatpush1.bf16.msra.mxu1 %v4914_v38  ;;  %2524 = vmatprep.subr.bf16.mxu0 %v4919_v33  ;;  %v4998_v38 = vld [vmem:[#allocation6 + $0xc0] ss:$16 sps:$4 sm:$0xff]  }
 0x1b8   :  { %2565 = vmatprep.subr.bf16.mxu1 %v4922_v34  ;;  %v5003_v34 = vld [vmem:[#allocation6 + $0xa4] ss:$16 sps:$4 sm:$0xff]  }
 0x1ba   :  { %2525 = vmatpush1.bf16.msra.mxu0 %v4917_v36 }
 0x1bb   :  { %2566 = vmatpush1.bf16.msra.mxu1 %v4920_v26  ;;  %2526 = vmatprep.subr.bf16.mxu0 %v4925_v37 }
 0x1bc   :  { %2567 = vmatprep.subr.bf16.mxu1 %v4928_v40  ;;  %v5001_v40 = vld [vmem:[#allocation6 + $0xa0] ss:$16 sps:$4 sm:$0xff]  }
 0x1be   :  { %2527 = vmatpush1.bf16.msra.mxu0 %v4923_v30 }
 0x1bf   :  { %2568 = vmatpush1.bf16.msra.mxu1 %v4926_v0  ;;  %2528 = vmatprep.subr.bf16.mxu0 %v4931_v41  ;;  %v5091_v41 = vld [vmem:[#allocation6 + $0x2e0] ss:$16 sps:$4 sm:$0xff]  }
 0x1c0   :  { %2569 = vmatprep.subr.bf16.mxu1 %v4934_v42  ;;  %v5093_v42 = vld [vmem:[#allocation6 + $0x2e4] ss:$16 sps:$4 sm:$0xff]  }
 0x1c2   :  { %2529 = vmatpush1.bf16.msra.mxu0 %v4929_v43  ;;  %v5009_v43 = vld [vmem:[#allocation6 + $0x64] ss:$16 sps:$4 sm:$0xff]  }
 0x1c3   :  { %2570 = vmatpush1.bf16.msra.mxu1 %v4932_v44  ;;  %2530 = vmatprep.subr.bf16.mxu0 %v4937_v45  ;;  %v5094_v44 = vld [vmem:[#allocation6 + $0x2c0] ss:$16 sps:$4 sm:$0xff]   ;;  %v5096_v45 = vld [vmem:[#allocation6 + $0x2c4] ss:$16 sps:$4 sm:$0xff]  }
 0x1c4   :  { %2571 = vmatprep.subr.bf16.mxu1 %v4940_v46  ;;  %v5007_v46 = vld [vmem:[#allocation6 + $0x60] ss:$16 sps:$4 sm:$0xff]  }
 0x1c6   :  { %2531 = vmatpush1.bf16.msra.mxu0 %v4935_v47  ;;  %v5099_v47 = vld [vmem:[#allocation6 + $0x2a4] ss:$16 sps:$4 sm:$0xff]  }
 0x1c7   :  { %2572 = vmatpush1.bf16.msra.mxu1 %v4938_v48  ;;  %2532 = vmatprep.subr.bf16.mxu0 %v4943_v49  ;;  %v5012_v48 = vld [vmem:[#allocation6 + $0x44] ss:$16 sps:$4 sm:$0xff]   ;;  %v5097_v49 = vld [vmem:[#allocation6 + $0x2a0] ss:$16 sps:$4 sm:$0xff]  }
 0x1c8   :  { %2573 = vmatprep.subr.bf16.mxu1 %v4946_v50  ;;  %v5010_v50 = vld [vmem:[#allocation6 + $0x40] ss:$16 sps:$4 sm:$0xff]  }
 0x1ca   :  { %2533 = vmatpush1.bf16.msra.mxu0 %v4941_v51  ;;  %v5102_v51 = vld [vmem:[#allocation6 + $0x284] ss:$16 sps:$4 sm:$0xff]  }
 0x1cb   :  { %2574 = vmatpush1.bf16.msra.mxu1 %v4944_v52  ;;  %2534 = vmatprep.subr.bf16.mxu0 %v4949_v53  ;;  %v5015_v52 = vld [vmem:[#allocation6 + $0x24] ss:$16 sps:$4 sm:$0xff]   ;;  %v5100_v53 = vld [vmem:[#allocation6 + $0x280] ss:$16 sps:$4 sm:$0xff]  }
 0x1cc   :  { %2575 = vmatprep.subr.bf16.mxu1 %v4952_v54  ;;  %v5013_v54 = vld [vmem:[#allocation6 + $0x20] ss:$16 sps:$4 sm:$0xff]  }
 0x1ce   :  { %2535 = vmatpush2.bf16.msra.mxu0 %v4947_v55  ;;  %v5105_v55 = vld [vmem:[#allocation6 + $0x264] ss:$16 sps:$4 sm:$0xff]  }
 0x1cf   :  { %2576 = vmatpush2.bf16.msra.mxu1 %v4950_v56  ;;  %2536 = vmatprep.subr.bf16.mxu0 %v4955_v57  ;;  %v5018_v56 = vld [vmem:[#allocation6 + $0x4] ss:$16 sps:$4 sm:$0xff]   ;;  %v5103_v57 = vld [vmem:[#allocation6 + $0x260] ss:$16 sps:$4 sm:$0xff]  }
 0x1d0   :  { %2577 = vmatprep.subr.bf16.mxu1 %v4958_v58  ;;  %v5016_v58 = vld [vmem:[#allocation6] ss:$16 sps:$4 sm:$0xff]  }
 0x1d2   :  { %2537 = vmatpush2.bf16.msra.mxu0 %v4953_v59  ;;  %v5108_v59 = vld [vmem:[#allocation6 + $0x244] ss:$16 sps:$4 sm:$0xff]  }
 0x1d3   :  { %2578 = vmatpush2.bf16.msra.mxu1 %v4956_v60  ;;  %2538 = vmatprep.subr.bf16.mxu0 %v4961_v6  ;;  %v5021_v60 = vld [vmem:[#allocation6 + $0x1e4] ss:$16 sps:$4 sm:$0xff]   ;;  %v5106_v6 = vld [vmem:[#allocation6 + $0x240] ss:$16 sps:$4 sm:$0xff]  }
 0x1d4   :  { %2579 = vmatprep.subr.bf16.mxu1 %v4964_v61  ;;  %v5019_v61 = vld [vmem:[#allocation6 + $0x1e0] ss:$16 sps:$4 sm:$0xff]  }
 0x1d6   :  { %2539 = vmatpush2.bf16.msra.mxu0 %v4959_v62  ;;  %v5111_v62 = vld [vmem:[#allocation6 + $0x224] ss:$16 sps:$4 sm:$0xff]  }
 0x1d7   :  { %2580 = vmatpush2.bf16.msra.mxu1 %v4962_v63  ;;  %2540 = vmatprep.subr.bf16.mxu0 %v4967_v1  ;;  %v5024_v63 = vld [vmem:[#allocation6 + $0x1c4] ss:$16 sps:$4 sm:$0xff]   ;;  %v5109_v1 = vld [vmem:[#allocation6 + $0x220] ss:$16 sps:$4 sm:$0xff]  }
 0x1d8   :  { %2581 = vmatprep.subr.bf16.mxu1 %v4970_v7  ;;  %v5022_v7 = vld [vmem:[#allocation6 + $0x1c0] ss:$16 sps:$4 sm:$0xff]  }
 0x1da   :  { %2541 = vmatpush2.bf16.msra.mxu0 %v4965_v3  ;;  %v5114_v3 = vld [vmem:[#allocation6 + $0x204] ss:$16 sps:$4 sm:$0xff]  }
 0x1db   :  { %2582 = vmatpush2.bf16.msra.mxu1 %v4968_v4  ;;  %2542 = vmatprep.subr.bf16.mxu0 %v4973_v13  ;;  %v5027_v4 = vld [vmem:[#allocation6 + $0x1a4] ss:$16 sps:$4 sm:$0xff]   ;;  %v5112_v13 = vld [vmem:[#allocation6 + $0x200] ss:$16 sps:$4 sm:$0xff]  }
 0x1dc   :  { %2583 = vmatprep.subr.bf16.mxu1 %v4976_v5  ;;  %v5025_v5 = vld [vmem:[#allocation6 + $0x1a0] ss:$16 sps:$4 sm:$0xff]  }
 0x1de   :  { %2543 = vmatpush2.bf16.msra.mxu0 %v4971_v2  ;;  %v5117_v2 = vld [vmem:[#allocation6 + $0x3e4] ss:$16 sps:$4 sm:$0xff]  }
 0x1df   :  { %2584 = vmatpush2.bf16.msra.mxu1 %v4974_v16  ;;  %2544 = vmatprep.subr.bf16.mxu0 %v4979_v17  ;;  %v5030_v16 = vld [vmem:[#allocation6 + $0x184] ss:$16 sps:$4 sm:$0xff]   ;;  %v5115_v17 = vld [vmem:[#allocation6 + $0x3e0] ss:$16 sps:$4 sm:$0xff]  }
 0x1e0   :  { %2585 = vmatprep.subr.bf16.mxu1 %v4982_v18  ;;  %v5028_v18 = vld [vmem:[#allocation6 + $0x180] ss:$16 sps:$4 sm:$0xff]  }
 0x1e2   :  { %2545 = vmatpush2.bf16.msra.mxu0 %v4977_v19  ;;  %v5120_v19 = vld [vmem:[#allocation6 + $0x3c4] ss:$16 sps:$4 sm:$0xff]  }
 0x1e3   :  { %2586 = vmatpush2.bf16.msra.mxu1 %v4980_v20  ;;  %2546 = vmatprep.subr.bf16.mxu0 %v4985_v21  ;;  %v5033_v20 = vld [vmem:[#allocation6 + $0x164] ss:$16 sps:$4 sm:$0xff]   ;;  %v5118_v21 = vld [vmem:[#allocation6 + $0x3c0] ss:$16 sps:$4 sm:$0xff]  }
 0x1e4   :  { %2587 = vmatprep.subr.bf16.mxu1 %v4988_v12  ;;  %v5031_v12 = vld [vmem:[#allocation6 + $0x160] ss:$16 sps:$4 sm:$0xff]  }
 0x1e6   :  { %2547 = vmatpush2.bf16.msra.mxu0 %v4983_v22  ;;  %v5123_v22 = vld [vmem:[#allocation6 + $0x3a4] ss:$16 sps:$4 sm:$0xff]  }
 0x1e7   :  { %2588 = vmatpush2.bf16.msra.mxu1 %v4986_v23  ;;  %2548 = vmatprep.subr.bf16.mxu0 %v4991_v24  ;;  %v5036_v23 = vld [vmem:[#allocation6 + $0x144] ss:$16 sps:$4 sm:$0xff]   ;;  %v5121_v24 = vld [vmem:[#allocation6 + $0x3a0] ss:$16 sps:$4 sm:$0xff]  }
 0x1e8   :  { %2589 = vmatprep.subr.bf16.mxu1 %v4994_v25  ;;  %v5034_v25 = vld [vmem:[#allocation6 + $0x140] ss:$16 sps:$4 sm:$0xff]  }
 0x1ea   :  { %2549 = vmatpush2.bf16.msra.mxu0 %v4989_v27  ;;  %v5126_v27 = vld [vmem:[#allocation6 + $0x384] ss:$16 sps:$4 sm:$0xff]  }
 0x1eb   :  { %2590 = vmatpush2.bf16.msra.mxu1 %v4992_v35  ;;  %3398 = vmatprep.subr.bf16.mxu0 %v4997_v28  ;;  %v5039_v35 = vld [vmem:[#allocation6 + $0x124] ss:$16 sps:$4 sm:$0xff]   ;;  %v5531_v28 = vld [vmem:[%s5573_s4] sm:$0xf] }
 0x1ec   :  { %3439 = vmatprep.subr.bf16.mxu1 %v5093_v42 }
 0x1ed   :  { %2551 = vmatmul.mubr.bf16.vlgmr.msra.gmra.mxu0 %v5508_v15  ;;  %v5519_v31 = vpop.f32.mrf.mxu0  ;;  %v5522_v32 = vpop.f32.mrf.mxu1  ;;  %v5006_v15 = vld [vmem:[#allocation6 + $0x84] ss:$16 sps:$4 sm:$0xff]  }
 0x1ee   :  { %2592 = vmatmul.mubr.bf16.vlgmr.msra.gmra.mxu1 %v5506_v14  ;;  %3399 = vmatpush1.bf16.msra.mxu0 %v4995_v29  ;;  %v5004_v14 = vld [vmem:[#allocation6 + $0x80] ss:$16 sps:$4 sm:$0xff]  }
 0x1ef   :  { %v5524_v33 = vpop.f32.mrf.mxu0  ;;  %3400 = vmatprep.subr.bf16.mxu0 %v5000_v39  ;;  %v5526_v36 = vpop.f32.mrf.mxu1  ;;  %3440 = vmatpush1.bf16.msra.mxu1 %v5091_v41  ;;  %v5124_v29 = vld [vmem:[#allocation6 + $0x380] ss:$16 sps:$4 sm:$0xff]  }
 0x1f0   :  { %3441 = vmatprep.subr.bf16.mxu1 %v5096_v45  ;;  %v5037_v39 = vld [vmem:[#allocation6 + $0x120] ss:$16 sps:$4 sm:$0xff]  }
 0x1f1   :  { %v2310_v26 = vpop.f32.mrf.mxu0  ;;  %v2351_v37 = vpop.f32.mrf.mxu1  ;;  %v5130_v41 = vld [vmem:[#allocation6 + $0x340] ss:$16 sps:$4 sm:$0xff]  }
 0x1f2   :  { %3401 = vmatpush1.bf16.msra.mxu0 %v4998_v38  ;;  %v5129_v38 = vld [vmem:[#allocation6 + $0x364] ss:$16 sps:$4 sm:$0xff]   ;;  %v975_v26 = vrot.slane %v5531_v28, %v5455_v8  ;;  %v5127_v37 = vld [vmem:[#allocation6 + $0x360] ss:$16 sps:$4 sm:$0xff]  }
 0x1f3   :  { %v2311_v30 = vpop.f32.mrf.mxu0  ;;  %3402 = vmatprep.subr.bf16.mxu0 %v5003_v34  ;;  %v2352_v0 = vpop.f32.mrf.mxu1  ;;  %3442 = vmatpush1.bf16.msra.mxu1 %v5094_v44  ;;  %v5042_v34 = vld [vmem:[#allocation6 + $0x104] ss:$16 sps:$4 sm:$0xff]  }
 0x1f4   :  { %3443 = vmatprep.subr.bf16.mxu1 %v5099_v47  ;;  %v5040_v30 = vld [vmem:[#allocation6 + $0x100] ss:$16 sps:$4 sm:$0xff]   ;;  %v5045_v0 = vld [vmem:[#allocation6 + $0xec] ss:$16 sps:$4 sm:$0xff]  }
 0x1f6   :  { %3403 = vmatpush1.bf16.msra.mxu0 %v5001_v40  ;;  %v979_v40 = vrot.slane %v5531_v28, %v5461_v10 }
 0x1f7   :  { %3404 = vmatprep.subr.bf16.mxu0 %v5006_v15  ;;  %3444 = vmatpush1.bf16.msra.mxu1 %v5097_v49  ;;  %v5132_v15 = vld [vmem:[#allocation6 + $0x344] ss:$16 sps:$4 sm:$0xff]  }
 0x1f8   :  { %3445 = vmatprep.subr.bf16.mxu1 %v5102_v51  ;;  %v2309_v42 = vadd.f32 %v5524_v33, %v979_v40 }
 0x1fa   :  { %3405 = vmatpush1.bf16.msra.mxu0 %v5004_v14  ;;  %v2307_v14 = vadd.f32 %v5519_v31, %v975_v26  ;;  %v2350_v45 = vadd.f32 %v5526_v36, %v2309_v42  ;;  %v5135_v31 = vld [vmem:[#allocation6 + $0x324] ss:$16 sps:$4 sm:$0xff]   ;;  %v5087_v26 = vld [vmem:[#allocation6 + $0x12c] ss:$16 sps:$4 sm:$0xff]  }
 0x1fb   :  { %3406 = vmatprep.subr.bf16.mxu0 %v5009_v43  ;;  %3446 = vmatpush1.bf16.msra.mxu1 %v5100_v53  ;;  %v5133_v53 = vld [vmem:[#allocation6 + $0x320] ss:$16 sps:$4 sm:$0xff]  }
 0x1fc   :  { %3447 = vmatprep.subr.bf16.mxu1 %v5105_v55  ;;  %v2348_v43 = vadd.f32 %v5522_v32, %v2307_v14 }
 0x1fe   :  { %3407 = vmatpush1.bf16.msra.mxu0 %v5007_v46 }
 0x1ff   :  { %3408 = vmatprep.subr.bf16.mxu0 %v5012_v48  ;;  %3448 = vmatpush1.bf16.msra.mxu1 %v5103_v57 }
 0x200   :  { %3449 = vmatprep.subr.bf16.mxu1 %v5108_v59  ;;  %v5136_v59 = vld [vmem:[#allocation6 + $0x300] ss:$16 sps:$4 sm:$0xff]  }
 0x202   :  { %3409 = vmatpush1.bf16.msra.mxu0 %v5010_v50 }
 0x203   :  { %3410 = vmatprep.subr.bf16.mxu0 %v5015_v52  ;;  %3450 = vmatpush1.bf16.msra.mxu1 %v5106_v6 }
 0x204   :  { %3451 = vmatprep.subr.bf16.mxu1 %v5111_v62  ;;  %v5141_v62 = vld [vmem:[#allocation6 + $0x2ec] ss:$16 sps:$4 sm:$0xff]  }
 0x206   :  { %3411 = vmatpush1.bf16.msra.mxu0 %v5013_v54 }
 0x207   :  { %3412 = vmatprep.subr.bf16.mxu0 %v5018_v56  ;;  %3452 = vmatpush1.bf16.msra.mxu1 %v5109_v1  ;;  %v5051_v1 = vld [vmem:[#allocation6 + $0xac] ss:$16 sps:$4 sm:$0xff]  }
 0x208   :  { %3453 = vmatprep.subr.bf16.mxu1 %v5114_v3  ;;  %v5054_v3 = vld [vmem:[#allocation6 + $0x8c] ss:$16 sps:$4 sm:$0xff]  }
 0x20a   :  { %3413 = vmatpush1.bf16.msra.mxu0 %v5016_v58  ;;  %v5138_v58 = vld [vmem:[#allocation6 + $0x304] ss:$16 sps:$4 sm:$0xff]  }
 0x20b   :  { %3414 = vmatprep.subr.bf16.mxu0 %v5021_v60  ;;  %3454 = vmatpush1.bf16.msra.mxu1 %v5112_v13  ;;  %v5043_v60 = vld [vmem:[#allocation6 + $0xe8] ss:$16 sps:$4 sm:$0xff]   ;;  %v5057_v13 = vld [vmem:[#allocation6 + $0x6c] ss:$16 sps:$4 sm:$0xff]  }
 0x20c   :  { %3455 = vmatprep.subr.bf16.mxu1 %v5117_v2  ;;  %v5060_v2 = vld [vmem:[#allocation6 + $0x4c] ss:$16 sps:$4 sm:$0xff]  }
 0x20e   :  { %3415 = vmatpush2.bf16.msra.mxu0 %v5019_v61  ;;  %v5048_v61 = vld [vmem:[#allocation6 + $0xcc] ss:$16 sps:$4 sm:$0xff]  }
 0x20f   :  { %3416 = vmatprep.subr.bf16.mxu0 %v5024_v63  ;;  %3456 = vmatpush2.bf16.msra.mxu1 %v5115_v17  ;;  %v5046_v63 = vld [vmem:[#allocation6 + $0xc8] ss:$16 sps:$4 sm:$0xff]   ;;  %v5063_v17 = vld [vmem:[#allocation6 + $0x2c] ss:$16 sps:$4 sm:$0xff]  }
 0x210   :  { %3457 = vmatprep.subr.bf16.mxu1 %v5120_v19  ;;  %v5066_v19 = vld [vmem:[#allocation6 + $0xc] ss:$16 sps:$4 sm:$0xff]  }
 0x212   :  { %3417 = vmatpush2.bf16.msra.mxu0 %v5022_v7  ;;  %v5049_v7 = vld [vmem:[#allocation6 + $0xa8] ss:$16 sps:$4 sm:$0xff]  }
 0x213   :  { %3418 = vmatprep.subr.bf16.mxu0 %v5027_v4  ;;  %3458 = vmatpush2.bf16.msra.mxu1 %v5118_v21  ;;  %v5052_v4 = vld [vmem:[#allocation6 + $0x88] ss:$16 sps:$4 sm:$0xff]   ;;  %v5069_v21 = vld [vmem:[#allocation6 + $0x1ec] ss:$16 sps:$4 sm:$0xff]  }
 0x214   :  { %3459 = vmatprep.subr.bf16.mxu1 %v5123_v22  ;;  %v5072_v22 = vld [vmem:[#allocation6 + $0x1cc] ss:$16 sps:$4 sm:$0xff]  }
 0x216   :  { %3419 = vmatpush2.bf16.msra.mxu0 %v5025_v5  ;;  %v5055_v5 = vld [vmem:[#allocation6 + $0x68] ss:$16 sps:$4 sm:$0xff]  }
 0x217   :  { %3420 = vmatprep.subr.bf16.mxu0 %v5030_v16  ;;  %3460 = vmatpush2.bf16.msra.mxu1 %v5121_v24  ;;  %v5058_v16 = vld [vmem:[#allocation6 + $0x48] ss:$16 sps:$4 sm:$0xff]   ;;  %v5075_v24 = vld [vmem:[#allocation6 + $0x1ac] ss:$16 sps:$4 sm:$0xff]  }
 0x218   :  { %3461 = vmatprep.subr.bf16.mxu1 %v5126_v27  ;;  %v5078_v27 = vld [vmem:[#allocation6 + $0x18c] ss:$16 sps:$4 sm:$0xff]  }
 0x21a   :  { %3421 = vmatpush2.bf16.msra.mxu0 %v5028_v18  ;;  %v5061_v18 = vld [vmem:[#allocation6 + $0x28] ss:$16 sps:$4 sm:$0xff]  }
 0x21b   :  { %3422 = vmatprep.subr.bf16.mxu0 %v5033_v20  ;;  %3462 = vmatpush2.bf16.msra.mxu1 %v5124_v29  ;;  %v5064_v20 = vld [vmem:[#allocation6 + $0x8] ss:$16 sps:$4 sm:$0xff]   ;;  %v5081_v29 = vld [vmem:[#allocation6 + $0x16c] ss:$16 sps:$4 sm:$0xff]  }
 0x21c   :  { %3463 = vmatprep.subr.bf16.mxu1 %v5129_v38  ;;  %v5084_v38 = vld [vmem:[#allocation6 + $0x14c] ss:$16 sps:$4 sm:$0xff]  }
 0x21e   :  { %3423 = vmatpush2.bf16.msra.mxu0 %v5031_v12  ;;  %v5067_v12 = vld [vmem:[#allocation6 + $0x1e8] ss:$16 sps:$4 sm:$0xff]  }
 0x21f   :  { %3424 = vmatprep.subr.bf16.mxu0 %v5036_v23  ;;  %3464 = vmatpush2.bf16.msra.mxu1 %v5127_v37  ;;  %v5070_v23 = vld [vmem:[#allocation6 + $0x1c8] ss:$16 sps:$4 sm:$0xff]  }
 0x220   :  { %3465 = vmatprep.subr.bf16.mxu1 %v5132_v15 }
 0x222   :  { %3425 = vmatpush2.bf16.msra.mxu0 %v5034_v25  ;;  %v5073_v25 = vld [vmem:[#allocation6 + $0x1a8] ss:$16 sps:$4 sm:$0xff]  }
 0x223   :  { %3426 = vmatprep.subr.bf16.mxu0 %v5039_v35  ;;  %3466 = vmatpush2.bf16.msra.mxu1 %v5130_v41  ;;  %v5076_v35 = vld [vmem:[#allocation6 + $0x188] ss:$16 sps:$4 sm:$0xff]  }
 0x224   :  { %3467 = vmatprep.subr.bf16.mxu1 %v5135_v31 }
 0x226   :  { %3427 = vmatpush2.bf16.msra.mxu0 %v5037_v39  ;;  %v5079_v39 = vld [vmem:[#allocation6 + $0x168] ss:$16 sps:$4 sm:$0xff]  }
 0x227   :  { %3428 = vmatprep.subr.bf16.mxu0 %v5042_v34  ;;  %3468 = vmatpush2.bf16.msra.mxu1 %v5133_v53  ;;  %v5082_v34 = vld [vmem:[#allocation6 + $0x148] ss:$16 sps:$4 sm:$0xff]  }
 0x228   :  { %3469 = vmatprep.subr.bf16.mxu1 %v5138_v58 }
 0x22a   :  { %3429 = vmatpush2.bf16.msra.mxu0 %v5040_v30  ;;  %v5085_v30 = vld [vmem:[#allocation6 + $0x128] ss:$16 sps:$4 sm:$0xff]  }
 0x22b   :  { %3480 = vmatprep.subr.bf16.mxu0 %v5045_v0  ;;  %3470 = vmatpush2.bf16.msra.mxu1 %v5136_v59  ;;  %v5090_v0 = vld [vmem:[#allocation6 + $0x10c] ss:$16 sps:$4 sm:$0xff]  }
 0x22c   :  { %3521 = vmatprep.subr.bf16.mxu1 %v5141_v62 }
 0x22d   :  { %v2388_v44 = vpop.f32.mrf.mxu0  ;;  %v2429_v47 = vpop.f32.mrf.mxu1 }
 0x22e   :  { %v2389_v46 = vadd.f32 %v2388_v44, %v2348_v43  ;;  %v5088_v43 = vld [vmem:[#allocation6 + $0x108] ss:$16 sps:$4 sm:$0xff]  }
 0x22f   :  { %v2390_v48 = vpop.f32.mrf.mxu0  ;;  %v2431_v51 = vpop.f32.mrf.mxu1 }
 0x230   :  { %v2430_v49 = vadd.f32 %v2429_v47, %v2389_v46  ;;  %v2391_v50 = vadd.f32 %v2390_v48, %v2350_v45  ;;  %v983_v46 = vrot.slane %v5531_v28, %v5458_v9  ;;  %v987_v47 = vrot.slane %v5531_v28, %v5464_v11  ;;  %v5139_v28 = vld [vmem:[#allocation6 + $0x2e8] ss:$16 sps:$4 sm:$0xff]  }
 0x231   :  { %v2392_v52 = vpop.f32.mrf.mxu0  ;;  %v2433_v33 = vpop.f32.mrf.mxu1 }
 0x232   :  { %v2432_v54 = vadd.f32 %v2431_v51, %v2391_v50  ;;  %v2600_v55 = vmax.f32 %v2430_v49, 0.0 }
 0x233   :  { %v2393_v56 = vpop.f32.mrf.mxu0  ;;  %v2434_v57 = vpop.f32.mrf.mxu1 }
 0x234   :  { %v2601_v32 = vmax.f32 %v2432_v54, 0.0  ;;  %v5541_v6 = vpack.c.bf16 %v2600_v55, %v2600_v55 }
 0x236   :  { %v2605_v36 = vpack.c.bf16 %v2601_v32, %v2601_v32 }
 0x238   :  { %3430 = vmatprep.mubr.bf16.mxu0 %v2605_v36 }
 0x239   :  { %3431 = vmatmul.mubr.bf16.vlgmr.msra.gmra.mxu0 %v5541_v6 }
 0x23a   :  { %3481 = vmatpush1.bf16.msra.mxu0 %v5043_v60  ;;  %3512 = vmatprep.mubr.bf16.mxu0 %v2605_v36 }
 0x23b   :  { %3482 = vmatprep.subr.bf16.mxu0 %v5048_v61 }
 0x23e   :  { %3483 = vmatpush1.bf16.msra.mxu0 %v5046_v63  ;;  %v5144_v63 = vld [vmem:[#allocation6 + $0x2cc] ss:$16 sps:$4 sm:$0xff]  }
 0x23f   :  { %3484 = vmatprep.subr.bf16.mxu0 %v5051_v1  ;;  %v5142_v1 = vld [vmem:[#allocation6 + $0x2c8] ss:$16 sps:$4 sm:$0xff]  }
 0x242   :  { %3485 = vmatpush1.bf16.msra.mxu0 %v5049_v7  ;;  %v5147_v7 = vld [vmem:[#allocation6 + $0x2ac] ss:$16 sps:$4 sm:$0xff]  }
 0x243   :  { %3486 = vmatprep.subr.bf16.mxu0 %v5054_v3  ;;  %v5145_v3 = vld [vmem:[#allocation6 + $0x2a8] ss:$16 sps:$4 sm:$0xff]  }
 0x246   :  { %3487 = vmatpush1.bf16.msra.mxu0 %v5052_v4  ;;  %v5150_v4 = vld [vmem:[#allocation6 + $0x28c] ss:$16 sps:$4 sm:$0xff]  }
 0x247   :  { %3488 = vmatprep.subr.bf16.mxu0 %v5057_v13  ;;  %v5187_v13 = vld [vmem:[#allocation7 + $0x78] sm:$0xff]  }
 0x24a   :  { %3489 = vmatpush1.bf16.msra.mxu0 %v5055_v5  ;;  %v5188_v5 = vld [vmem:[#allocation7 + $0x38] sm:$0xff]  }
 0x24b   :  { %3490 = vmatprep.subr.bf16.mxu0 %v5060_v2  ;;  %v5189_v2 = vld [vmem:[#allocation7 + $0x70] sm:$0xff]  }
 0x24e   :  { %3491 = vmatpush1.bf16.msra.mxu0 %v5058_v16  ;;  %v5148_v16 = vld [vmem:[#allocation6 + $0x288] ss:$16 sps:$4 sm:$0xff]  }
 0x24f   :  { %3492 = vmatprep.subr.bf16.mxu0 %v5063_v17  ;;  %v5190_v17 = vld [vmem:[#allocation7 + $0x30] sm:$0xff]  }
 0x252   :  { %3493 = vmatpush1.bf16.msra.mxu0 %v5061_v18  ;;  %v5153_v18 = vld [vmem:[#allocation6 + $0x26c] ss:$16 sps:$4 sm:$0xff]  }
 0x253   :  { %3494 = vmatprep.subr.bf16.mxu0 %v5066_v19  ;;  %v5191_v19 = vld [vmem:[#allocation7 + $0x68] sm:$0xff]  }
 0x256   :  { %3495 = vmatpush1.bf16.msra.mxu0 %v5064_v20  ;;  %v5151_v20 = vld [vmem:[#allocation6 + $0x268] ss:$16 sps:$4 sm:$0xff]  }
 0x257   :  { %3496 = vmatprep.subr.bf16.mxu0 %v5069_v21  ;;  %v5192_v21 = vld [vmem:[#allocation7 + $0x28] sm:$0xff]  }
 0x25a   :  { %3497 = vmatpush2.bf16.msra.mxu0 %v5067_v12  ;;  %v5156_v12 = vld [vmem:[#allocation6 + $0x24c] ss:$16 sps:$4 sm:$0xff]  }
 0x25b   :  { %3498 = vmatprep.subr.bf16.mxu0 %v5072_v22  ;;  %v5193_v22 = vld [vmem:[#allocation7 + $0x60] sm:$0xff]  }
 0x25e   :  { %3499 = vmatpush2.bf16.msra.mxu0 %v5070_v23  ;;  %v5154_v23 = vld [vmem:[#allocation6 + $0x248] ss:$16 sps:$4 sm:$0xff]  }
 0x25f   :  { %3500 = vmatprep.subr.bf16.mxu0 %v5075_v24  ;;  %v5194_v24 = vld [vmem:[#allocation7 + $0x20] sm:$0xff]  }
 0x262   :  { %3501 = vmatpush2.bf16.msra.mxu0 %v5073_v25  ;;  %v5159_v25 = vld [vmem:[#allocation6 + $0x22c] ss:$16 sps:$4 sm:$0xff]  }
 0x263   :  { %3502 = vmatprep.subr.bf16.mxu0 %v5078_v27  ;;  %v5195_v27 = vld [vmem:[#allocation7 + $0x58] sm:$0xff]  }
 0x266   :  { %3503 = vmatpush2.bf16.msra.mxu0 %v5076_v35  ;;  %v5157_v35 = vld [vmem:[#allocation6 + $0x228] ss:$16 sps:$4 sm:$0xff]  }
 0x267   :  { %3504 = vmatprep.subr.bf16.mxu0 %v5081_v29  ;;  %v5196_v29 = vld [vmem:[#allocation7 + $0x18] sm:$0xff]  }
 0x26a   :  { %3505 = vmatpush2.bf16.msra.mxu0 %v5079_v39  ;;  %v5162_v39 = vld [vmem:[#allocation6 + $0x20c] ss:$16 sps:$4 sm:$0xff]  }
 0x26b   :  { %3506 = vmatprep.subr.bf16.mxu0 %v5084_v38  ;;  %v5197_v38 = vld [vmem:[#allocation7 + $0x50] sm:$0xff]  }
 0x26d   :  { %v2470_v37 = vpop.f32.mrf.mxu0 }
 0x26e   :  { %v2511_v40 = vpop.f32.mrf.mxu1  ;;  %3507 = vmatpush2.bf16.msra.mxu0 %v5082_v34  ;;  %v2471_v48 = vadd.f32 %v2470_v37, %v983_v46  ;;  %v5160_v34 = vld [vmem:[#allocation6 + $0x208] ss:$16 sps:$4 sm:$0xff]   ;;  %v5165_v37 = vld [vmem:[#allocation6 + $0x3ec] ss:$16 sps:$4 sm:$0xff]  }
 0x26f   :  { %v2472_v15 = vpop.f32.mrf.mxu0  ;;  %3508 = vmatprep.subr.bf16.mxu0 %v5087_v26  ;;  %v5198_v26 = vld [vmem:[#allocation7 + $0x10] sm:$0xff]   ;;  %v5178_v46 = vld [vmem:[#allocation6 + $0x348] ss:$16 sps:$4 sm:$0xff]  }
 0x270   :  { %v2513_v14 = vpop.f32.mrf.mxu1  ;;  %v2473_v49 = vadd.f32 %v2472_v15, %v987_v47  ;;  %v2512_v50 = vadd.f32 %v2511_v40, %v2471_v48  ;;  %v5163_v40 = vld [vmem:[#allocation6 + $0x3e8] ss:$16 sps:$4 sm:$0xff]   ;;  %v5183_v47 = vld [vmem:[#allocation6 + $0x32c] ss:$16 sps:$4 sm:$0xff]  }
 0x271   :  { %v2474_v41 = vpop.f32.mrf.mxu0  ;;  %v5166_v15 = vld [vmem:[#allocation6 + $0x3c8] ss:$16 sps:$4 sm:$0xff]  }
 0x272   :  { %v2515_v42 = vpop.f32.mrf.mxu1  ;;  %3509 = vmatpush2.bf16.msra.mxu0 %v5085_v30  ;;  %v2514_v31 = vadd.f32 %v2513_v14, %v2473_v49  ;;  %v5168_v30 = vld [vmem:[#allocation6 + $0x3cc] ss:$16 sps:$4 sm:$0xff]   ;;  %v5169_v14 = vld [vmem:[#allocation6 + $0x3a8] ss:$16 sps:$4 sm:$0xff]  }
 0x273   :  { %v2475_v44 = vpop.f32.mrf.mxu0  ;;  %3510 = vmatprep.subr.bf16.mxu0 %v5090_v0  ;;  %v5171_v0 = vld [vmem:[#allocation6 + $0x3ac] ss:$16 sps:$4 sm:$0xff]   ;;  %v5172_v42 = vld [vmem:[#allocation6 + $0x388] ss:$16 sps:$4 sm:$0xff]  }
 0x274   :  { %v2516_v45 = vpop.f32.mrf.mxu1  ;;  %v5174_v41 = vld [vmem:[#allocation6 + $0x38c] ss:$16 sps:$4 sm:$0xff]   ;;  %v5175_v44 = vld [vmem:[#allocation6 + $0x368] ss:$16 sps:$4 sm:$0xff]  }
 0x275   :  { %v5180_v45 = vld [vmem:[#allocation6 + $0x34c] ss:$16 sps:$4 sm:$0xff]   ;;  %v5181_v48 = vld [vmem:[#allocation6 + $0x328] ss:$16 sps:$4 sm:$0xff]  }
 0x276   :  { %3511 = vmatpush2.bf16.msra.mxu0 %v5088_v43  ;;  %v5177_v43 = vld [vmem:[#allocation6 + $0x36c] ss:$16 sps:$4 sm:$0xff]  }
 0x277   :  { %4524 = vmatprep.subr.bf16.mxu0 %v5187_v13  ;;  %v5186_v49 = vld [vmem:[#allocation6 + $0x30c] ss:$16 sps:$4 sm:$0xff]  }
 0x279   :  { %3513 = vmatmul.mubr.bf16.vlgmr.msra.gmra.mxu0 %v5541_v6 }
 0x27a   :  { %4525 = vmatpush3.bf16.msra.mxu0 %v5188_v5 }
 0x27b   :  { %4526 = vmatprep.subr.bf16.mxu0 %v5189_v2  ;;  %v5215_v2 = vld [vmem:[#allocation7 + $0xc8] sm:$0xff]  }
 0x27e   :  { %4527 = vmatpush3.bf16.msra.mxu0 %v5190_v17  ;;  %v5216_v17 = vld [vmem:[#allocation7 + $0x88] sm:$0xff]  }
 0x27f   :  { %4528 = vmatprep.subr.bf16.mxu0 %v5191_v19 }
 0x282   :  { %4529 = vmatpush3.bf16.msra.mxu0 %v5192_v21 }
 0x283   :  { %4530 = vmatprep.subr.bf16.mxu0 %v5193_v22 }
 0x286   :  { %4531 = vmatpush3.bf16.msra.mxu0 %v5194_v24 }
 0x287   :  { %4532 = vmatprep.subr.bf16.mxu0 %v5195_v27 }
 0x28a   :  { %4533 = vmatpush3.bf16.msra.mxu0 %v5196_v29 }
 0x28b   :  { %4534 = vmatprep.subr.bf16.mxu0 %v5197_v38 }
 0x28e   :  { %4535 = vmatpush3.bf16.msra.mxu0 %v5198_v26 }
 0x2ad   :  { %v2552_v51 = vpop.f32.mrf.mxu0 }
 0x2ae   :  { %v2553_v52 = vadd.f32 %v2552_v51, %v2512_v50  ;;  %v2593_v53 = vpop.f32.mrf.mxu1  ;;  %v5184_v50 = vld [vmem:[#allocation6 + $0x308] ss:$16 sps:$4 sm:$0xff]  }
 0x2af   :  { %v2554_v54 = vpop.f32.mrf.mxu0 }
 0x2b0   :  { %v2594_v33 = vadd.f32 %v2593_v53, %v2553_v52  ;;  %v2555_v55 = vadd.f32 %v2554_v54, %v2514_v31  ;;  %v2595_v56 = vpop.f32.mrf.mxu1  ;;  %v5199_v52 = vld [vmem:[#allocation7 + $0x48] sm:$0xff]  }
 0x2b1   :  { %v2556_v32 = vpop.f32.mrf.mxu0  ;;  %v5200_v53 = vld [vmem:[#allocation7 + $0x8] sm:$0xff]   ;;  %4536 = vmatprep.subr.bf16.mxu0 %v5199_v52 }
 0x2b2   :  { %v2596_v57 = vadd.f32 %v2595_v56, %v2555_v55  ;;  %v2597_v58 = vpop.f32.mrf.mxu1  ;;  %v2602_v59 = vmax.f32 %v2594_v33, 0.0  ;;  %4537 = vmatpush3.bf16.msra.mxu0 %v5200_v53  ;;  %v5201_v55 = vld [vmem:[#allocation7 + $0x40] sm:$0xff]   ;;  %v5203_v32 = vld [vmem:[#allocation7 + $0xf8] sm:$0xff]  }
 0x2b3   :  { %v2557_v36 = vpop.f32.mrf.mxu0  ;;  %v5202_v56 = vld [vmem:[#allocation7] sm:$0xff]   ;;  %4538 = vmatprep.subr.bf16.mxu0 %v5201_v55  ;;  %v5205_v58 = vld [vmem:[#allocation7 + $0xf0] sm:$0xff]  }
 0x2b4   :  { %v2603_v60 = vmax.f32 %v2596_v57, 0.0  ;;  %v2598_v6 = vpop.f32.mrf.mxu1  ;;  %v5549_v62 = vpack.c.bf16 %v2602_v59, %v2602_v59  ;;  %v5204_v57 = vld [vmem:[#allocation7 + $0xb8] sm:$0xff]   ;;  %v5206_v59 = vld [vmem:[#allocation7 + $0xb0] sm:$0xff]   ;;  %v5207_v36 = vld [vmem:[#allocation7 + $0xe8] sm:$0xff]  }
 0x2b5   :  { %v5209_v6 = vld [vmem:[#allocation7 + $0xe0] sm:$0xff]  }
 0x2b6   :  { %v2607_v61 = vpack.c.bf16 %v2603_v60, %v2603_v60  ;;  %4539 = vmatpush3.bf16.msra.mxu0 %v5202_v56  ;;  %v5208_v60 = vld [vmem:[#allocation7 + $0xa8] sm:$0xff]   ;;  %v4482_v56 = vld [vmem:[%s5577_s8] ss:$0 sm:$0xff] }
 0x2b8   :  { %3471 = vmatprep.mubr.bf16.mxu1 %v2607_v61 }
 0x2b9   :  { %3472 = vmatmul.mubr.bf16.vlgmr.msra.gmra.mxu1 %v5549_v62 }
 0x2ba   :  { %3522 = vmatpush1.bf16.msra.mxu1 %v5139_v28  ;;  %3553 = vmatprep.mubr.bf16.mxu1 %v2607_v61  ;;  %v5210_v61 = vld [vmem:[#allocation7 + $0xa0] sm:$0xff]   ;;  %v5211_v28 = vld [vmem:[#allocation7 + $0xd8] sm:$0xff]  }
 0x2bb   :  { %3523 = vmatprep.subr.bf16.mxu1 %v5144_v63  ;;  %v5213_v63 = vld [vmem:[#allocation7 + $0xd0] sm:$0xff]  }
 0x2be   :  { %3524 = vmatpush1.bf16.msra.mxu1 %v5142_v1  ;;  %v5214_v1 = vld [vmem:[#allocation7 + $0x90] sm:$0xff]  }
 0x2bf   :  { %3525 = vmatprep.subr.bf16.mxu1 %v5147_v7  ;;  %v2736_v7 = vld [vmem:[%s5575_s6] sm:$0xf] }
 0x2c0   :  { %v2741_v22 = vrot.slane %v2736_v7, %v5455_v8 }
 0x2c2   :  { %3526 = vmatpush1.bf16.msra.mxu1 %v5145_v3  ;;  %v2749_v3 = vrot.slane %v2736_v7, %v5458_v9  ;;  %v2745_v9 = vrot.slane %v2736_v7, %v5461_v10 }
 0x2c3   :  { %3527 = vmatprep.subr.bf16.mxu1 %v5150_v4  ;;  %v2753_v4 = vrot.slane %v2736_v7, %v5464_v11 }
 0x2c6   :  { %3528 = vmatpush1.bf16.msra.mxu1 %v5148_v16 }
 0x2c7   :  { %3529 = vmatprep.subr.bf16.mxu1 %v5153_v18 }
 0x2ca   :  { %3530 = vmatpush1.bf16.msra.mxu1 %v5151_v20  ;;  %v5217_v20 = vld [vmem:[#allocation7 + $0xc0] sm:$0xff]  }
 0x2cb   :  { %3531 = vmatprep.subr.bf16.mxu1 %v5156_v12  ;;  %v5218_v12 = vld [vmem:[#allocation7 + $0x80] sm:$0xff]  }
 0x2ce   :  { %3532 = vmatpush1.bf16.msra.mxu1 %v5154_v23 }
 0x2cf   :  { %3533 = vmatprep.subr.bf16.mxu1 %v5159_v25 }
 0x2d2   :  { %3534 = vmatpush1.bf16.msra.mxu1 %v5157_v35 }
 0x2d3   :  { %3535 = vmatprep.subr.bf16.mxu1 %v5162_v39 }
 0x2d6   :  { %3536 = vmatpush1.bf16.msra.mxu1 %v5160_v34 }
 0x2d7   :  { %3537 = vmatprep.subr.bf16.mxu1 %v5165_v37 }
 0x2da   :  { %3538 = vmatpush2.bf16.msra.mxu1 %v5163_v40 }
 0x2db   :  { %3539 = vmatprep.subr.bf16.mxu1 %v5168_v30 }
 0x2de   :  { %3540 = vmatpush2.bf16.msra.mxu1 %v5166_v15 }
 0x2df   :  { %3541 = vmatprep.subr.bf16.mxu1 %v5171_v0 }
 0x2e2   :  { %3542 = vmatpush2.bf16.msra.mxu1 %v5169_v14 }
 0x2e3   :  { %3543 = vmatprep.subr.bf16.mxu1 %v5174_v41 }
 0x2e6   :  { %3544 = vmatpush2.bf16.msra.mxu1 %v5172_v42 }
 0x2e7   :  { %3545 = vmatprep.subr.bf16.mxu1 %v5177_v43 }
 0x2ea   :  { %3546 = vmatpush2.bf16.msra.mxu1 %v5175_v44  ;;  %v5219_v44 = vld [vmem:[#allocation9 + $0x38] sm:$0xff]  }
 0x2eb   :  { %3547 = vmatprep.subr.bf16.mxu1 %v5180_v45  ;;  %v5345_v45 = vmov 0.0  }
 0x2ec   :  { %4577 = vmatprep.subr.bf16.mxu0 %v5345_v45 }
 0x2ee   :  { %3548 = vmatpush2.bf16.msra.mxu1 %v5178_v46  ;;  %v5220_v46 = vld [vmem:[#allocation9 + $0x30] sm:$0xff]  }
 0x2ef   :  { %3549 = vmatprep.subr.bf16.mxu1 %v5183_v47  ;;  %v5221_v47 = vld [vmem:[#allocation9 + $0x28] sm:$0xff]  }
 0x2f2   :  { %3550 = vmatpush2.bf16.msra.mxu1 %v5181_v48  ;;  %v5222_v48 = vld [vmem:[#allocation9 + $0x20] sm:$0xff]  }
 0x2f3   :  { %3551 = vmatprep.subr.bf16.mxu1 %v5186_v49  ;;  %v5223_v49 = vld [vmem:[#allocation9 + $0x18] sm:$0xff]  }
 0x2f6   :  { %3552 = vmatpush2.bf16.msra.mxu1 %v5184_v50  ;;  %v5224_v50 = vld [vmem:[#allocation9 + $0x10] sm:$0xff]  }
 0x2f7   :  { %4546 = vmatprep.subr.bf16.mxu1 %v5203_v32 }
 0x2f9   :  { %3554 = vmatmul.mubr.bf16.vlgmr.msra.gmra.mxu1 %v5549_v62  ;;  %v3432_v51 = vpop.f32.mrf.mxu0  ;;  %v5212_v62 = vld [vmem:[#allocation7 + $0x98] sm:$0xff]  }
 0x2fa   :  { %4547 = vmatpush3.bf16.msra.mxu1 %v5204_v57  ;;  %v3433_v23 = vadd.f32 %v3432_v51, %v2741_v22  ;;  %v5225_v51 = vld [vmem:[#allocation9 + $0x8] sm:$0xff]  }
 0x2fb   :  { %v3434_v31 = vpop.f32.mrf.mxu0  ;;  %4548 = vmatprep.subr.bf16.mxu1 %v5205_v58 }
 0x2fc   :  { %v3435_v24 = vadd.f32 %v3434_v31, %v2745_v9  ;;  %v5226_v31 = vld [vmem:[#allocation9] sm:$0xff]  }
 0x2fd   :  { %v3436_v54 = vpop.f32.mrf.mxu0 }
 0x2fe   :  { %4549 = vmatpush3.bf16.msra.mxu1 %v5206_v59 }
 0x2ff   :  { %v3437_v33 = vpop.f32.mrf.mxu0  ;;  %4550 = vmatprep.subr.bf16.mxu1 %v5207_v36 }
 0x302   :  { %4551 = vmatpush3.bf16.msra.mxu1 %v5208_v60 }
 0x303   :  { %4552 = vmatprep.subr.bf16.mxu1 %v5209_v6 }
 0x306   :  { %4553 = vmatpush3.bf16.msra.mxu1 %v5210_v61 }
 0x307   :  { %4554 = vmatprep.subr.bf16.mxu1 %v5211_v28 }
 0x30a   :  { %4555 = vmatpush3.bf16.msra.mxu1 %v5212_v62  ;;  %v4515_v62 = vld [vmem:[%s5579_s10] ss:$0 sm:$0xff] }
 0x30b   :  { %4556 = vmatprep.subr.bf16.mxu1 %v5213_v63 }
 0x30e   :  { %4557 = vmatpush3.bf16.msra.mxu1 %v5214_v1 }
 0x30f   :  { %4558 = vmatprep.subr.bf16.mxu1 %v5215_v2 }
 0x312   :  { %4559 = vmatpush3.bf16.msra.mxu1 %v5216_v17 }
 0x313   :  { %4560 = vmatprep.subr.bf16.mxu1 %v5217_v20 }
 0x316   :  { %4561 = vmatpush3.bf16.msra.mxu1 %v5218_v12 }
 0x339   :  { %v3514_v13 = vpop.f32.mrf.mxu0 }
 0x33a   :  { %v3515_v5 = vadd.f32 %v3514_v13, %v2749_v3 }
 0x33b   :  { %v3516_v16 = vpop.f32.mrf.mxu0 }
 0x33c   :  { %v3517_v18 = vadd.f32 %v3516_v16, %v2753_v4 }
 0x33d   :  { %v3518_v19 = vpop.f32.mrf.mxu0 }
 0x33f   :  { %v3519_v21 = vpop.f32.mrf.mxu0 }
 0x379   :  { %v3473_v11 = vpop.f32.mrf.mxu1 }
 0x37a   :  { %v3474_v25 = vadd.f32 %v3473_v11, %v3433_v23 }
 0x37b   :  { %v3475_v27 = vpop.f32.mrf.mxu1 }
 0x37c   :  { %v3476_v35 = vadd.f32 %v3475_v27, %v3435_v24  ;;  %v3562_v29 = vmax.f32 %v3474_v25, 0.0 }
 0x37d   :  { %v3477_v39 = vpop.f32.mrf.mxu1 }
 0x37e   :  { %v3563_v38 = vmax.f32 %v3476_v35, 0.0  ;;  %v3566_v37 = vpack.c.bf16 %v3562_v29, %v3562_v29 }
 0x37f   :  { %v3478_v34 = vpop.f32.mrf.mxu1 }
 0x380   :  { %v3567_v26 = vpack.c.bf16 %v3563_v38, %v3563_v38 }
 0x382   :  { %3865 = vmatprep.mubr.bf16.mxu0 %v3567_v26 }
 0x383   :  { %3866 = vmatmul.mubr.bf16.vlgmr.msra.gmra.mxu0 %v3566_v37 }
 0x384   :  { %4578 = vmatpush3.bf16.msra.mxu0 %v5219_v44  ;;  %4593 = vmatprep.mubr.msk.bf16.mxu0 %vm5346_vm0, %v5345_v45 }
 0x385   :  { %4579 = vmatprep.subr.bf16.mxu0 %v5345_v45 }
 0x388   :  { %4580 = vmatpush3.bf16.msra.mxu0 %v5220_v46 }
 0x389   :  { %4581 = vmatprep.subr.bf16.mxu0 %v5345_v45 }
 0x38c   :  { %4582 = vmatpush3.bf16.msra.mxu0 %v5221_v47 }
 0x38d   :  { %4583 = vmatprep.subr.bf16.mxu0 %v5345_v45 }
 0x390   :  { %4584 = vmatpush3.bf16.msra.mxu0 %v5222_v48 }
 0x391   :  { %4585 = vmatprep.subr.bf16.mxu0 %v5345_v45 }
 0x394   :  { %4586 = vmatpush3.bf16.msra.mxu0 %v5223_v49 }
 0x395   :  { %4587 = vmatprep.subr.bf16.mxu0 %v5345_v45 }
 0x398   :  { %4588 = vmatpush3.bf16.msra.mxu0 %v5224_v50 }
 0x399   :  { %4589 = vmatprep.subr.bf16.mxu0 %v5345_v45 }
 0x39c   :  { %4590 = vmatpush3.bf16.msra.mxu0 %v5225_v51 }
 0x39d   :  { %4591 = vmatprep.subr.bf16.mxu0 %v5345_v45 }
 0x3a0   :  { %4592 = vmatpush3.bf16.msra.mxu0 %v5226_v31 }
 0x3b9   :  { %v3555_v40 = vpop.f32.mrf.mxu1 }
 0x3ba   :  { %v3556_v30 = vadd.f32 %v3555_v40, %v3515_v5 }
 0x3bb   :  { %v3557_v15 = vpop.f32.mrf.mxu1 }
 0x3bc   :  { %v3558_v8 = vadd.f32 %v3557_v15, %v3517_v18  ;;  %v3564_v0 = vmax.f32 %v3556_v30, 0.0 }
 0x3bd   :  { %v3559_v10 = vpop.f32.mrf.mxu1 }
 0x3be   :  { %v3565_v14 = vmax.f32 %v3558_v8, 0.0  ;;  %v3568_v43 = vpack.c.bf16 %v3564_v0, %v3564_v0 }
 0x3bf   :  { %v3560_v41 = vpop.f32.mrf.mxu1 }
 0x3c0   :  { %v3569_v42 = vpack.c.bf16 %v3565_v14, %v3565_v14 }
 0x3c2   :  { %3905 = vmatprep.mubr.bf16.mxu1 %v3569_v42 }
 0x3c3   :  { %3906 = vmatmul.mubr.bf16.vlgmr.msra.gmra.mxu1 %v3568_v43 }
 0x443   :  { %v4540_v52 = vpop.f32.mrf.mxu0 }
 0x445   :  { %v4541_v53 = vpop.f32.mrf.mxu0 }
 0x446   :  { %v4542_v55 = vadd.f32 %v4541_v53, %v4540_v52 }
 0x447   :  { %v4543_v54 = vpop.f32.mrf.mxu0 }
 0x448   :  { %v3868_v58 = vadd.f32 %v4542_v55, %v4482_v56 }
 0x449   :  { %v4544_v33 = vpop.f32.mrf.mxu0 }
 0x483   :  { %v4562_v32 = vpop.f32.mrf.mxu1 }
 0x485   :  { %v4563_v57 = vpop.f32.mrf.mxu1 }
 0x486   :  { %v4564_v59 = vadd.f32 %v4563_v57, %v4562_v32 }
 0x487   :  { %v4565_v36 = vpop.f32.mrf.mxu1 }
 0x488   :  { %v3908_v60 = vadd.f32 %v4564_v59, %v3868_v58 }
 0x489   :  { %v4566_v6 = vpop.f32.mrf.mxu1 }
 0x48a   :  { %v3913_v61 = vmax.f32 %v3908_v60, 0.0 }
 0x48c   :  { %v3914_v28 = vpack.c.bf16 %v3913_v61, %v3913_v61 }
 0x48e   :  { %4594 = vmatmul.mubr.bf16.vlgmr.msra.gmra.mxu0 %v3914_v28 }
 0x54e   :  { %v4020_v63 = vpop.f32.mrf.mxu0 }
 0x54f   :  { %v4021_v1 = vadd.f32 %v4515_v62, %v4020_v63 }
 0x550   :  { %v4595_v7 = vpop.f32.mrf.mxu0 }
 0x551   :  { %4026 = vst [vmem:[%s5580_s11] sm:$0xff] %v4021_v1 }
 0x552   :  { %v4023_v3 = vpop.f32.mrf.mxu0 }
 0x554   :  { %v4596_v4 = vpop.f32.mrf.mxu0 }
 0x555   :  { %4031 = vsyncpa [#allocation3], 1 }
 0x556   :  { %4032 = vsyncpa [#allocation5], 1 }
 0x557   :  { %4033 = vsyncpa [#allocation8], 1 }

</bundles_post_ra>
